<compile_context>
chip_gen: v7x
topology: tpu7x:2x2x1
jax: 0.10.0
libtpu: 0.0.40
codegen_flags: <defaults>
</compile_context>

<pallas_src>
import jax
import jax.numpy as jnp
from jax.experimental import pallas as pl
from jax.experimental.pallas import tpu as pltpu


# ----------------------------- fused Pallas kernel --------------------------

def _fused_kernel(p_ref, wf_ref, bf_ref, a_ref, bt_ref, o_ref):
    """Fused patch-embed + 1x1 seg-head + separable bilinear upsample (one batch).

    p_ref : (1, K, h*w)   bf16  im2col patches (K on sublanes, patch idx on lanes)
    wf_ref: (NC, K)       bf16  folded weight  (seg_w @ patch_w)
    bf_ref: (NC, 1)       f32   folded bias    (seg_w @ patch_b + seg_b)
    a_ref : (H, h)        f32   row-interpolation matrix (shared across planes)
    bt_ref: (w, W)        f32   column-interpolation matrix (transposed)
    o_ref : (1, NC*H, W)  f32   upsampled per-class logits, planes stacked on rows
    """
    NC = wf_ref.shape[0]
    H, h = a_ref.shape
    w, W = bt_ref.shape

    # Patch embed + seg head in one MXU matmul (bf16 in, f32 accumulate).
    logits = jnp.dot(wf_ref[...], p_ref[0],
                     preferred_element_type=jnp.float32) + bf_ref[...]   # (NC, h*w)

    # Per-plane separable bilinear interpolation, entirely in VMEM / f32.
    # NC is small and static, so the loop is unrolled at trace time; the plane is
    # rebuilt from static lane slices (the hw -> (h, w) relayout now happens once,
    # in VMEM, instead of as an XLA relayout between two kernels).
    for nc in range(NC):
        plane = jnp.concatenate(
            [logits[nc:nc + 1, i * w:(i + 1) * w] for i in range(h)], axis=0)  # (h, w)
        t = jnp.dot(plane, bt_ref[...], preferred_element_type=jnp.float32)    # (h, W)
        o_ref[0, nc * H:(nc + 1) * H, :] = jnp.dot(
            a_ref[...], t, preferred_element_type=jnp.float32)                 # (H, W)


# ----------------------------- wrapper ---------------------------------------

def _bilinear_matrix(out_size, in_size):
    """Interpolation matrix matching F.interpolate(mode='bilinear', align_corners=False)."""
    scale = in_size / out_size
    i = jnp.arange(out_size, dtype=jnp.float32)
    src = jnp.maximum((i + 0.5) * scale - 0.5, 0.0)
    i0 = jnp.minimum(jnp.floor(src).astype(jnp.int32), in_size - 1)
    i1 = jnp.minimum(i0 + 1, in_size - 1)
    w1 = src - i0.astype(jnp.float32)
    w0 = 1.0 - w1
    return (jax.nn.one_hot(i0, in_size, dtype=jnp.float32) * w0[:, None]
            + jax.nn.one_hot(i1, in_size, dtype=jnp.float32) * w1[:, None])


def cast_segformer_forward(x, params, *, patch_size):
    """JAX/Pallas equivalent of CastSegFormer.forward (simplified patch_embed)."""
    B, C, H, W = x.shape
    P = patch_size
    h, w = H // P, W // P
    hw = h * w
    K = C * P * P                      # no round-up padding: Mosaic pads K in VMEM

    E = params["patch_w"].shape[0]
    NC = params["seg_w"].shape[0]

    # Host prep: one fused transpose+cast pass over x (no pad, no extra copy).
    # TODO(synk): fold this im2col into the kernel DMA (index_map over patch
    # coordinates) at production sizes; it is moot once the real ConvStem lands.
    patches = (x.reshape(B, C, h, P, w, P)
                 .transpose(0, 1, 3, 5, 2, 4)
                 .reshape(B, K, hw)
                 .astype(jnp.bfloat16))

    # Fold the 1x1 seg-head conv into the patch-embed projection.
    # NOTE: only valid while there is no nonlinearity between patch embed and the
    # seg head; must be dropped when the real ConvStem (BN+ReLU) is used.
    w1 = params["patch_w"].reshape(E, K)                              # (E, K)
    w2 = params["seg_w"].reshape(NC, E)                               # (NC, E)
    wf = (w2 @ w1).astype(jnp.bfloat16)                               # (NC, K)
    bf = (w2 @ params["patch_b"] + params["seg_b"]).reshape(NC, 1)    # (NC, 1) f32

    # Interpolation matrices stay f32 (exact bilinear weights regardless of ratio).
    a_mat = _bilinear_matrix(H, h)            # (H, h)
    bt_mat = _bilinear_matrix(W, w).T         # (w, W)

    out = pl.pallas_call(
        _fused_kernel,
        out_shape=jax.ShapeDtypeStruct((B, NC * H, W), jnp.float32),
        grid_spec=pltpu.PrefetchScalarGridSpec(
            num_scalar_prefetch=0,
            grid=(B,),                         # B >= 2 keeps both v7x TCs busy
            in_specs=[
                pl.BlockSpec((1, K, hw), lambda b: (b, 0, 0)),
                pl.BlockSpec((NC, K), lambda b: (0, 0)),
                pl.BlockSpec((NC, 1), lambda b: (0, 0)),
                pl.BlockSpec((H, h), lambda b: (0, 0)),
                pl.BlockSpec((w, W), lambda b: (0, 0)),
            ],
            out_specs=pl.BlockSpec((1, NC * H, W), lambda b: (b, 0, 0)),
        ),
        compiler_params=pltpu.CompilerParams(
            dimension_semantics=("parallel",),
        ),
    )(patches, wf, bf, a_mat, bt_mat)

    # Splitting a non-minor dim: metadata-only, no relayout.
    return out.reshape(B, NC, H, W)


# ----------------------------- reference (pure JAX, f32) ---------------------

def _reference(x, params, *, patch_size):
    B, C, H, W = x.shape
    P = patch_size
    h, w = H // P, W // P
    E = params["patch_w"].shape[0]
    NC = params["seg_w"].shape[0]
    patches = x.reshape(B, C, h, P, w, P).transpose(0, 2, 4, 1, 3, 5).reshape(B * h * w, -1)
    hidden = patches @ params["patch_w"].reshape(E, -1).T + params["patch_b"]
    logits = hidden @ params["seg_w"].reshape(NC, -1).T + params["seg_b"]
    logits = logits.reshape(B, h, w, NC).transpose(0, 3, 1, 2)
    A = _bilinear_matrix(H, h)
    Bw = _bilinear_matrix(W, w)
    return jnp.einsum("Hh,bchw,Ww->bcHW", A, logits, Bw)


# ----------------------------- main -------------------------------------------

if __name__ == "__main__":
    B, C, H, W = 2, 3, 64, 64
    patch_size = 8
    embed_dim = 64
    num_classes = 8

    key = jax.random.PRNGKey(0)
    k1, k2, k3, k4, kx = jax.random.split(key, 5)
    params = {
        "patch_w": 0.02 * jax.random.normal(k1, (embed_dim, C, patch_size, patch_size), jnp.float32),
        "patch_b": 0.01 * jax.random.normal(k2, (embed_dim,), jnp.float32),
        "seg_w":   0.02 * jax.random.normal(k3, (num_classes, embed_dim, 1, 1), jnp.float32),
        "seg_b":   0.01 * jax.random.normal(k4, (num_classes,), jnp.float32),
    }
    x = jax.random.normal(kx, (B, C, H, W), jnp.float32)

    out = jax.jit(lambda xx: cast_segformer_forward(xx, params, patch_size=patch_size))(x)
    out = jax.block_until_ready(out)

    assert out.shape == (B, num_classes, H, W), out.shape
    assert out.dtype == jnp.float32

    ref = _reference(x, params, patch_size=patch_size)
    # bf16 MXU inputs for the patch-embed matmul (f32 accumulation, f32 interp)
    # -> small extra error vs the pure-f32 reference.
    assert jnp.allclose(out, ref, rtol=2e-2, atol=2e-2), float(jnp.max(jnp.abs(out - ref)))

    print("KERNEL_OK")
</pallas_src>

<mosaic_0001>
module attributes {stable_mosaic.version = 11 : i64} {
  func.func @_fused_kernel(%arg0: i32, %arg1: memref<1x192x64xbf16, #tpu.memory_space<vmem>>, %arg2: memref<8x192xbf16, #tpu.memory_space<vmem>>, %arg3: memref<8x1xf32, #tpu.memory_space<vmem>>, %arg4: memref<64x8xf32, #tpu.memory_space<vmem>>, %arg5: memref<8x64xf32, #tpu.memory_space<vmem>>, %arg6: memref<1x512x64xf32, #tpu.memory_space<vmem>>) attributes {dimension_semantics = [#tpu.dimension_semantics<parallel>], iteration_bounds = array<i64: 2>, scalar_prefetch = 0 : i64, scratch_operands = 0 : i64, tpu.core_type = #tpu.core_type<tc>, window_params = [{transform_indices = @transform_0, window_bounds = array<i64: 1, 192, 64>}, {pipeline_mode = #tpu.pipeline_mode<synchronous>, transform_indices = @transform_1, window_bounds = array<i64: 8, 192>}, {pipeline_mode = #tpu.pipeline_mode<synchronous>, transform_indices = @transform_2, window_bounds = array<i64: 8, 1>}, {pipeline_mode = #tpu.pipeline_mode<synchronous>, transform_indices = @transform_3, window_bounds = array<i64: 64, 8>}, {pipeline_mode = #tpu.pipeline_mode<synchronous>, transform_indices = @transform_4, window_bounds = array<i64: 8, 64>}, {transform_indices = @transform_5, window_bounds = array<i64: 1, 512, 64>}]} {
    %c0 = arith.constant 0 : index
    %c0_0 = arith.constant 0 : index
    %0 = vector.load %arg2[%c0, %c0_0] : memref<8x192xbf16, #tpu.memory_space<vmem>>, vector<8x192xbf16>
    %c0_1 = arith.constant 0 : index
    %c0_2 = arith.constant 0 : index
    %c0_3 = arith.constant 0 : index
    %1 = vector.load %arg1[%c0_1, %c0_2, %c0_3] : memref<1x192x64xbf16, #tpu.memory_space<vmem>>, vector<1x192x64xbf16>
    %2 = vector.shape_cast %1 : vector<1x192x64xbf16> to vector<192x64xbf16>
    %cst = arith.constant dense<0.000000e+00> : vector<8x64xf32>
    %3 = tpu.matmul %0, %2, %cst {dimension_numbers = #tpu.dot_dimension_numbers<[1], [0], [0], [1], [0, 0, 1, 1], [], []>} : vector<8x192xbf16>, vector<192x64xbf16>, vector<8x64xf32> -> vector<8x64xf32>
    %c0_4 = arith.constant 0 : index
    %c0_5 = arith.constant 0 : index
    %4 = vector.load %arg3[%c0_4, %c0_5] : memref<8x1xf32, #tpu.memory_space<vmem>>, vector<8x1xf32>
    %5 = vector.broadcast %4 : vector<8x1xf32> to vector<8x64xf32>
    %6 = arith.addf %3, %5 : vector<8x64xf32>
    %7 = vector.extract_strided_slice %6 {offsets = [0, 0], sizes = [1, 8], strides = [1, 1]} : vector<8x64xf32> to vector<1x8xf32>
    %8 = vector.extract_strided_slice %6 {offsets = [0, 8], sizes = [1, 8], strides = [1, 1]} : vector<8x64xf32> to vector<1x8xf32>
    %9 = vector.extract_strided_slice %6 {offsets = [0, 16], sizes = [1, 8], strides = [1, 1]} : vector<8x64xf32> to vector<1x8xf32>
    %10 = vector.extract_strided_slice %6 {offsets = [0, 24], sizes = [1, 8], strides = [1, 1]} : vector<8x64xf32> to vector<1x8xf32>
    %11 = vector.extract_strided_slice %6 {offsets = [0, 32], sizes = [1, 8], strides = [1, 1]} : vector<8x64xf32> to vector<1x8xf32>
    %12 = vector.extract_strided_slice %6 {offsets = [0, 40], sizes = [1, 8], strides = [1, 1]} : vector<8x64xf32> to vector<1x8xf32>
    %13 = vector.extract_strided_slice %6 {offsets = [0, 48], sizes = [1, 8], strides = [1, 1]} : vector<8x64xf32> to vector<1x8xf32>
    %14 = vector.extract_strided_slice %6 {offsets = [0, 56], sizes = [1, 8], strides = [1, 1]} : vector<8x64xf32> to vector<1x8xf32>
    %15 = tpu.concatenate %7, %8, %9, %10, %11, %12, %13, %14 in 0 : vector<1x8xf32>, vector<1x8xf32>, vector<1x8xf32>, vector<1x8xf32>, vector<1x8xf32>, vector<1x8xf32>, vector<1x8xf32>, vector<1x8xf32> -> vector<8x8xf32>
    %c0_6 = arith.constant 0 : index
    %c0_7 = arith.constant 0 : index
    %16 = vector.load %arg5[%c0_6, %c0_7] : memref<8x64xf32, #tpu.memory_space<vmem>>, vector<8x64xf32>
    %cst_8 = arith.constant dense<0.000000e+00> : vector<8x64xf32>
    %17 = tpu.matmul %15, %16, %cst_8 {dimension_numbers = #tpu.dot_dimension_numbers<[1], [0], [0], [1], [0, 0, 1, 1], [], []>} : vector<8x8xf32>, vector<8x64xf32>, vector<8x64xf32> -> vector<8x64xf32>
    %c0_9 = arith.constant 0 : index
    %c0_10 = arith.constant 0 : index
    %18 = vector.load %arg4[%c0_9, %c0_10] : memref<64x8xf32, #tpu.memory_space<vmem>>, vector<64x8xf32>
    %cst_11 = arith.constant dense<0.000000e+00> : vector<64x64xf32>
    %19 = tpu.matmul %18, %17, %cst_11 {dimension_numbers = #tpu.dot_dimension_numbers<[1], [0], [0], [1], [0, 0, 1, 1], [], []>} : vector<64x8xf32>, vector<8x64xf32>, vector<64x64xf32> -> vector<64x64xf32>
    %c0_12 = arith.constant 0 : index
    %c0_13 = arith.constant 0 : index
    %c0_14 = arith.constant 0 : index
    %20 = vector.load %arg6[%c0_12, %c0_13, %c0_14] : memref<1x512x64xf32, #tpu.memory_space<vmem>>, vector<1x64x64xf32>
    %21 = vector.shape_cast %20 : vector<1x64x64xf32> to vector<64x64xf32>
    %22 = vector.shape_cast %19 : vector<64x64xf32> to vector<1x64x64xf32>
    tpu.vector_store %arg6[%c0_12, %c0_13, %c0_14], %22 {strides = array<i32>} : memref<1x512x64xf32, #tpu.memory_space<vmem>>, vector<1x64x64xf32>,
    %23 = vector.extract_strided_slice %6 {offsets = [1, 0], sizes = [1, 8], strides = [1, 1]} : vector<8x64xf32> to vector<1x8xf32>
    %24 = vector.extract_strided_slice %6 {offsets = [1, 8], sizes = [1, 8], strides = [1, 1]} : vector<8x64xf32> to vector<1x8xf32>
    %25 = vector.extract_strided_slice %6 {offsets = [1, 16], sizes = [1, 8], strides = [1, 1]} : vector<8x64xf32> to vector<1x8xf32>
    %26 = vector.extract_strided_slice %6 {offsets = [1, 24], sizes = [1, 8], strides = [1, 1]} : vector<8x64xf32> to vector<1x8xf32>
    %27 = vector.extract_strided_slice %6 {offsets = [1, 32], sizes = [1, 8], strides = [1, 1]} : vector<8x64xf32> to vector<1x8xf32>
    %28 = vector.extract_strided_slice %6 {offsets = [1, 40], sizes = [1, 8], strides = [1, 1]} : vector<8x64xf32> to vector<1x8xf32>
    %29 = vector.extract_strided_slice %6 {offsets = [1, 48], sizes = [1, 8], strides = [1, 1]} : vector<8x64xf32> to vector<1x8xf32>
    %30 = vector.extract_strided_slice %6 {offsets = [1, 56], sizes = [1, 8], strides = [1, 1]} : vector<8x64xf32> to vector<1x8xf32>
    %31 = tpu.concatenate %23, %24, %25, %26, %27, %28, %29, %30 in 0 : vector<1x8xf32>, vector<1x8xf32>, vector<1x8xf32>, vector<1x8xf32>, vector<1x8xf32>, vector<1x8xf32>, vector<1x8xf32>, vector<1x8xf32> -> vector<8x8xf32>
    %c0_15 = arith.constant 0 : index
    %c0_16 = arith.constant 0 : index
    %32 = vector.load %arg5[%c0_15, %c0_16] : memref<8x64xf32, #tpu.memory_space<vmem>>, vector<8x64xf32>
    %cst_17 = arith.constant dense<0.000000e+00> : vector<8x64xf32>
    %33 = tpu.matmul %31, %32, %cst_17 {dimension_numbers = #tpu.dot_dimension_numbers<[1], [0], [0], [1], [0, 0, 1, 1], [], []>} : vector<8x8xf32>, vector<8x64xf32>, vector<8x64xf32> -> vector<8x64xf32>
    %c0_18 = arith.constant 0 : index
    %c0_19 = arith.constant 0 : index
    %34 = vector.load %arg4[%c0_18, %c0_19] : memref<64x8xf32, #tpu.memory_space<vmem>>, vector<64x8xf32>
    %cst_20 = arith.constant dense<0.000000e+00> : vector<64x64xf32>
    %35 = tpu.matmul %34, %33, %cst_20 {dimension_numbers = #tpu.dot_dimension_numbers<[1], [0], [0], [1], [0, 0, 1, 1], [], []>} : vector<64x8xf32>, vector<8x64xf32>, vector<64x64xf32> -> vector<64x64xf32>
    %c0_21 = arith.constant 0 : index
    %c64 = arith.constant 64 : index
    %c0_22 = arith.constant 0 : index
    %36 = vector.load %arg6[%c0_21, %c64, %c0_22] : memref<1x512x64xf32, #tpu.memory_space<vmem>>, vector<1x64x64xf32>
    %37 = vector.shape_cast %36 : vector<1x64x64xf32> to vector<64x64xf32>
    %38 = vector.shape_cast %35 : vector<64x64xf32> to vector<1x64x64xf32>
    tpu.vector_store %arg6[%c0_21, %c64, %c0_22], %38 {strides = array<i32>} : memref<1x512x64xf32, #tpu.memory_space<vmem>>, vector<1x64x64xf32>,
    %39 = vector.extract_strided_slice %6 {offsets = [2, 0], sizes = [1, 8], strides = [1, 1]} : vector<8x64xf32> to vector<1x8xf32>
    %40 = vector.extract_strided_slice %6 {offsets = [2, 8], sizes = [1, 8], strides = [1, 1]} : vector<8x64xf32> to vector<1x8xf32>
    %41 = vector.extract_strided_slice %6 {offsets = [2, 16], sizes = [1, 8], strides = [1, 1]} : vector<8x64xf32> to vector<1x8xf32>
    %42 = vector.extract_strided_slice %6 {offsets = [2, 24], sizes = [1, 8], strides = [1, 1]} : vector<8x64xf32> to vector<1x8xf32>
    %43 = vector.extract_strided_slice %6 {offsets = [2, 32], sizes = [1, 8], strides = [1, 1]} : vector<8x64xf32> to vector<1x8xf32>
    %44 = vector.extract_strided_slice %6 {offsets = [2, 40], sizes = [1, 8], strides = [1, 1]} : vector<8x64xf32> to vector<1x8xf32>
    %45 = vector.extract_strided_slice %6 {offsets = [2, 48], sizes = [1, 8], strides = [1, 1]} : vector<8x64xf32> to vector<1x8xf32>
    %46 = vector.extract_strided_slice %6 {offsets = [2, 56], sizes = [1, 8], strides = [1, 1]} : vector<8x64xf32> to vector<1x8xf32>
    %47 = tpu.concatenate %39, %40, %41, %42, %43, %44, %45, %46 in 0 : vector<1x8xf32>, vector<1x8xf32>, vector<1x8xf32>, vector<1x8xf32>, vector<1x8xf32>, vector<1x8xf32>, vector<1x8xf32>, vector<1x8xf32> -> vector<8x8xf32>
    %c0_23 = arith.constant 0 : index
    %c0_24 = arith.constant 0 : index
    %48 = vector.load %arg5[%c0_23, %c0_24] : memref<8x64xf32, #tpu.memory_space<vmem>>, vector<8x64xf32>
    %cst_25 = arith.constant dense<0.000000e+00> : vector<8x64xf32>
    %49 = tpu.matmul %47, %48, %cst_25 {dimension_numbers = #tpu.dot_dimension_numbers<[1], [0], [0], [1], [0, 0, 1, 1], [], []>} : vector<8x8xf32>, vector<8x64xf32>, vector<8x64xf32> -> vector<8x64xf32>
    %c0_26 = arith.constant 0 : index
    %c0_27 = arith.constant 0 : index
    %50 = vector.load %arg4[%c0_26, %c0_27] : memref<64x8xf32, #tpu.memory_space<vmem>>, vector<64x8xf32>
    %cst_28 = arith.constant dense<0.000000e+00> : vector<64x64xf32>
    %51 = tpu.matmul %50, %49, %cst_28 {dimension_numbers = #tpu.dot_dimension_numbers<[1], [0], [0], [1], [0, 0, 1, 1], [], []>} : vector<64x8xf32>, vector<8x64xf32>, vector<64x64xf32> -> vector<64x64xf32>
    %c0_29 = arith.constant 0 : index
    %c128 = arith.constant 128 : index
    %c0_30 = arith.constant 0 : index
    %52 = vector.load %arg6[%c0_29, %c128, %c0_30] : memref<1x512x64xf32, #tpu.memory_space<vmem>>, vector<1x64x64xf32>
    %53 = vector.shape_cast %52 : vector<1x64x64xf32> to vector<64x64xf32>
    %54 = vector.shape_cast %51 : vector<64x64xf32> to vector<1x64x64xf32>
    tpu.vector_store %arg6[%c0_29, %c128, %c0_30], %54 {strides = array<i32>} : memref<1x512x64xf32, #tpu.memory_space<vmem>>, vector<1x64x64xf32>,
    %55 = vector.extract_strided_slice %6 {offsets = [3, 0], sizes = [1, 8], strides = [1, 1]} : vector<8x64xf32> to vector<1x8xf32>
    %56 = vector.extract_strided_slice %6 {offsets = [3, 8], sizes = [1, 8], strides = [1, 1]} : vector<8x64xf32> to vector<1x8xf32>
    %57 = vector.extract_strided_slice %6 {offsets = [3, 16], sizes = [1, 8], strides = [1, 1]} : vector<8x64xf32> to vector<1x8xf32>
    %58 = vector.extract_strided_slice %6 {offsets = [3, 24], sizes = [1, 8], strides = [1, 1]} : vector<8x64xf32> to vector<1x8xf32>
    %59 = vector.extract_strided_slice %6 {offsets = [3, 32], sizes = [1, 8], strides = [1, 1]} : vector<8x64xf32> to vector<1x8xf32>
    %60 = vector.extract_strided_slice %6 {offsets = [3, 40], sizes = [1, 8], strides = [1, 1]} : vector<8x64xf32> to vector<1x8xf32>
    %61 = vector.extract_strided_slice %6 {offsets = [3, 48], sizes = [1, 8], strides = [1, 1]} : vector<8x64xf32> to vector<1x8xf32>
    %62 = vector.extract_strided_slice %6 {offsets = [3, 56], sizes = [1, 8], strides = [1, 1]} : vector<8x64xf32> to vector<1x8xf32>
    %63 = tpu.concatenate %55, %56, %57, %58, %59, %60, %61, %62 in 0 : vector<1x8xf32>, vector<1x8xf32>, vector<1x8xf32>, vector<1x8xf32>, vector<1x8xf32>, vector<1x8xf32>, vector<1x8xf32>, vector<1x8xf32> -> vector<8x8xf32>
    %c0_31 = arith.constant 0 : index
    %c0_32 = arith.constant 0 : index
    %64 = vector.load %arg5[%c0_31, %c0_32] : memref<8x64xf32, #tpu.memory_space<vmem>>, vector<8x64xf32>
    %cst_33 = arith.constant dense<0.000000e+00> : vector<8x64xf32>
    %65 = tpu.matmul %63, %64, %cst_33 {dimension_numbers = #tpu.dot_dimension_numbers<[1], [0], [0], [1], [0, 0, 1, 1], [], []>} : vector<8x8xf32>, vector<8x64xf32>, vector<8x64xf32> -> vector<8x64xf32>
    %c0_34 = arith.constant 0 : index
    %c0_35 = arith.constant 0 : index
    %66 = vector.load %arg4[%c0_34, %c0_35] : memref<64x8xf32, #tpu.memory_space<vmem>>, vector<64x8xf32>
    %cst_36 = arith.constant dense<0.000000e+00> : vector<64x64xf32>
    %67 = tpu.matmul %66, %65, %cst_36 {dimension_numbers = #tpu.dot_dimension_numbers<[1], [0], [0], [1], [0, 0, 1, 1], [], []>} : vector<64x8xf32>, vector<8x64xf32>, vector<64x64xf32> -> vector<64x64xf32>
    %c0_37 = arith.constant 0 : index
    %c192 = arith.constant 192 : index
    %c0_38 = arith.constant 0 : index
    %68 = vector.load %arg6[%c0_37, %c192, %c0_38] : memref<1x512x64xf32, #tpu.memory_space<vmem>>, vector<1x64x64xf32>
    %69 = vector.shape_cast %68 : vector<1x64x64xf32> to vector<64x64xf32>
    %70 = vector.shape_cast %67 : vector<64x64xf32> to vector<1x64x64xf32>
    tpu.vector_store %arg6[%c0_37, %c192, %c0_38], %70 {strides = array<i32>} : memref<1x512x64xf32, #tpu.memory_space<vmem>>, vector<1x64x64xf32>,
    %71 = vector.extract_strided_slice %6 {offsets = [4, 0], sizes = [1, 8], strides = [1, 1]} : vector<8x64xf32> to vector<1x8xf32>
    %72 = vector.extract_strided_slice %6 {offsets = [4, 8], sizes = [1, 8], strides = [1, 1]} : vector<8x64xf32> to vector<1x8xf32>
    %73 = vector.extract_strided_slice %6 {offsets = [4, 16], sizes = [1, 8], strides = [1, 1]} : vector<8x64xf32> to vector<1x8xf32>
    %74 = vector.extract_strided_slice %6 {offsets = [4, 24], sizes = [1, 8], strides = [1, 1]} : vector<8x64xf32> to vector<1x8xf32>
    %75 = vector.extract_strided_slice %6 {offsets = [4, 32], sizes = [1, 8], strides = [1, 1]} : vector<8x64xf32> to vector<1x8xf32>
    %76 = vector.extract_strided_slice %6 {offsets = [4, 40], sizes = [1, 8], strides = [1, 1]} : vector<8x64xf32> to vector<1x8xf32>
    %77 = vector.extract_strided_slice %6 {offsets = [4, 48], sizes = [1, 8], strides = [1, 1]} : vector<8x64xf32> to vector<1x8xf32>
    %78 = vector.extract_strided_slice %6 {offsets = [4, 56], sizes = [1, 8], strides = [1, 1]} : vector<8x64xf32> to vector<1x8xf32>
    %79 = tpu.concatenate %71, %72, %73, %74, %75, %76, %77, %78 in 0 : vector<1x8xf32>, vector<1x8xf32>, vector<1x8xf32>, vector<1x8xf32>, vector<1x8xf32>, vector<1x8xf32>, vector<1x8xf32>, vector<1x8xf32> -> vector<8x8xf32>
    %c0_39 = arith.constant 0 : index
    %c0_40 = arith.constant 0 : index
    %80 = vector.load %arg5[%c0_39, %c0_40] : memref<8x64xf32, #tpu.memory_space<vmem>>, vector<8x64xf32>
    %cst_41 = arith.constant dense<0.000000e+00> : vector<8x64xf32>
    %81 = tpu.matmul %79, %80, %cst_41 {dimension_numbers = #tpu.dot_dimension_numbers<[1], [0], [0], [1], [0, 0, 1, 1], [], []>} : vector<8x8xf32>, vector<8x64xf32>, vector<8x64xf32> -> vector<8x64xf32>
    %c0_42 = arith.constant 0 : index
    %c0_43 = arith.constant 0 : index
    %82 = vector.load %arg4[%c0_42, %c0_43] : memref<64x8xf32, #tpu.memory_space<vmem>>, vector<64x8xf32>
    %cst_44 = arith.constant dense<0.000000e+00> : vector<64x64xf32>
    %83 = tpu.matmul %82, %81, %cst_44 {dimension_numbers = #tpu.dot_dimension_numbers<[1], [0], [0], [1], [0, 0, 1, 1], [], []>} : vector<64x8xf32>, vector<8x64xf32>, vector<64x64xf32> -> vector<64x64xf32>
    %c0_45 = arith.constant 0 : index
    %c256 = arith.constant 256 : index
    %c0_46 = arith.constant 0 : index
    %84 = vector.load %arg6[%c0_45, %c256, %c0_46] : memref<1x512x64xf32, #tpu.memory_space<vmem>>, vector<1x64x64xf32>
    %85 = vector.shape_cast %84 : vector<1x64x64xf32> to vector<64x64xf32>
    %86 = vector.shape_cast %83 : vector<64x64xf32> to vector<1x64x64xf32>
    tpu.vector_store %arg6[%c0_45, %c256, %c0_46], %86 {strides = array<i32>} : memref<1x512x64xf32, #tpu.memory_space<vmem>>, vector<1x64x64xf32>,
    %87 = vector.extract_strided_slice %6 {offsets = [5, 0], sizes = [1, 8], strides = [1, 1]} : vector<8x64xf32> to vector<1x8xf32>
    %88 = vector.extract_strided_slice %6 {offsets = [5, 8], sizes = [1, 8], strides = [1, 1]} : vector<8x64xf32> to vector<1x8xf32>
    %89 = vector.extract_strided_slice %6 {offsets = [5, 16], sizes = [1, 8], strides = [1, 1]} : vector<8x64xf32> to vector<1x8xf32>
    %90 = vector.extract_strided_slice %6 {offsets = [5, 24], sizes = [1, 8], strides = [1, 1]} : vector<8x64xf32> to vector<1x8xf32>
    %91 = vector.extract_strided_slice %6 {offsets = [5, 32], sizes = [1, 8], strides = [1, 1]} : vector<8x64xf32> to vector<1x8xf32>
    %92 = vector.extract_strided_slice %6 {offsets = [5, 40], sizes = [1, 8], strides = [1, 1]} : vector<8x64xf32> to vector<1x8xf32>
    %93 = vector.extract_strided_slice %6 {offsets = [5, 48], sizes = [1, 8], strides = [1, 1]} : vector<8x64xf32> to vector<1x8xf32>
    %94 = vector.extract_strided_slice %6 {offsets = [5, 56], sizes = [1, 8], strides = [1, 1]} : vector<8x64xf32> to vector<1x8xf32>
    %95 = tpu.concatenate %87, %88, %89, %90, %91, %92, %93, %94 in 0 : vector<1x8xf32>, vector<1x8xf32>, vector<1x8xf32>, vector<1x8xf32>, vector<1x8xf32>, vector<1x8xf32>, vector<1x8xf32>, vector<1x8xf32> -> vector<8x8xf32>
    %c0_47 = arith.constant 0 : index
    %c0_48 = arith.constant 0 : index
    %96 = vector.load %arg5[%c0_47, %c0_48] : memref<8x64xf32, #tpu.memory_space<vmem>>, vector<8x64xf32>
    %cst_49 = arith.constant dense<0.000000e+00> : vector<8x64xf32>
    %97 = tpu.matmul %95, %96, %cst_49 {dimension_numbers = #tpu.dot_dimension_numbers<[1], [0], [0], [1], [0, 0, 1, 1], [], []>} : vector<8x8xf32>, vector<8x64xf32>, vector<8x64xf32> -> vector<8x64xf32>
    %c0_50 = arith.constant 0 : index
    %c0_51 = arith.constant 0 : index
    %98 = vector.load %arg4[%c0_50, %c0_51] : memref<64x8xf32, #tpu.memory_space<vmem>>, vector<64x8xf32>
    %cst_52 = arith.constant dense<0.000000e+00> : vector<64x64xf32>
    %99 = tpu.matmul %98, %97, %cst_52 {dimension_numbers = #tpu.dot_dimension_numbers<[1], [0], [0], [1], [0, 0, 1, 1], [], []>} : vector<64x8xf32>, vector<8x64xf32>, vector<64x64xf32> -> vector<64x64xf32>
    %c0_53 = arith.constant 0 : index
    %c320 = arith.constant 320 : index
    %c0_54 = arith.constant 0 : index
    %100 = vector.load %arg6[%c0_53, %c320, %c0_54] : memref<1x512x64xf32, #tpu.memory_space<vmem>>, vector<1x64x64xf32>
    %101 = vector.shape_cast %100 : vector<1x64x64xf32> to vector<64x64xf32>
    %102 = vector.shape_cast %99 : vector<64x64xf32> to vector<1x64x64xf32>
    tpu.vector_store %arg6[%c0_53, %c320, %c0_54], %102 {strides = array<i32>} : memref<1x512x64xf32, #tpu.memory_space<vmem>>, vector<1x64x64xf32>,
    %103 = vector.extract_strided_slice %6 {offsets = [6, 0], sizes = [1, 8], strides = [1, 1]} : vector<8x64xf32> to vector<1x8xf32>
    %104 = vector.extract_strided_slice %6 {offsets = [6, 8], sizes = [1, 8], strides = [1, 1]} : vector<8x64xf32> to vector<1x8xf32>
    %105 = vector.extract_strided_slice %6 {offsets = [6, 16], sizes = [1, 8], strides = [1, 1]} : vector<8x64xf32> to vector<1x8xf32>
    %106 = vector.extract_strided_slice %6 {offsets = [6, 24], sizes = [1, 8], strides = [1, 1]} : vector<8x64xf32> to vector<1x8xf32>
    %107 = vector.extract_strided_slice %6 {offsets = [6, 32], sizes = [1, 8], strides = [1, 1]} : vector<8x64xf32> to vector<1x8xf32>
    %108 = vector.extract_strided_slice %6 {offsets = [6, 40], sizes = [1, 8], strides = [1, 1]} : vector<8x64xf32> to vector<1x8xf32>
    %109 = vector.extract_strided_slice %6 {offsets = [6, 48], sizes = [1, 8], strides = [1, 1]} : vector<8x64xf32> to vector<1x8xf32>
    %110 = vector.extract_strided_slice %6 {offsets = [6, 56], sizes = [1, 8], strides = [1, 1]} : vector<8x64xf32> to vector<1x8xf32>
    %111 = tpu.concatenate %103, %104, %105, %106, %107, %108, %109, %110 in 0 : vector<1x8xf32>, vector<1x8xf32>, vector<1x8xf32>, vector<1x8xf32>, vector<1x8xf32>, vector<1x8xf32>, vector<1x8xf32>, vector<1x8xf32> -> vector<8x8xf32>
    %c0_55 = arith.constant 0 : index
    %c0_56 = arith.constant 0 : index
    %112 = vector.load %arg5[%c0_55, %c0_56] : memref<8x64xf32, #tpu.memory_space<vmem>>, vector<8x64xf32>
    %cst_57 = arith.constant dense<0.000000e+00> : vector<8x64xf32>
    %113 = tpu.matmul %111, %112, %cst_57 {dimension_numbers = #tpu.dot_dimension_numbers<[1], [0], [0], [1], [0, 0, 1, 1], [], []>} : vector<8x8xf32>, vector<8x64xf32>, vector<8x64xf32> -> vector<8x64xf32>
    %c0_58 = arith.constant 0 : index
    %c0_59 = arith.constant 0 : index
    %114 = vector.load %arg4[%c0_58, %c0_59] : memref<64x8xf32, #tpu.memory_space<vmem>>, vector<64x8xf32>
    %cst_60 = arith.constant dense<0.000000e+00> : vector<64x64xf32>
    %115 = tpu.matmul %114, %113, %cst_60 {dimension_numbers = #tpu.dot_dimension_numbers<[1], [0], [0], [1], [0, 0, 1, 1], [], []>} : vector<64x8xf32>, vector<8x64xf32>, vector<64x64xf32> -> vector<64x64xf32>
    %c0_61 = arith.constant 0 : index
    %c384 = arith.constant 384 : index
    %c0_62 = arith.constant 0 : index
    %116 = vector.load %arg6[%c0_61, %c384, %c0_62] : memref<1x512x64xf32, #tpu.memory_space<vmem>>, vector<1x64x64xf32>
    %117 = vector.shape_cast %116 : vector<1x64x64xf32> to vector<64x64xf32>
    %118 = vector.shape_cast %115 : vector<64x64xf32> to vector<1x64x64xf32>
    tpu.vector_store %arg6[%c0_61, %c384, %c0_62], %118 {strides = array<i32>} : memref<1x512x64xf32, #tpu.memory_space<vmem>>, vector<1x64x64xf32>,
    %119 = vector.extract_strided_slice %6 {offsets = [7, 0], sizes = [1, 8], strides = [1, 1]} : vector<8x64xf32> to vector<1x8xf32>
    %120 = vector.extract_strided_slice %6 {offsets = [7, 8], sizes = [1, 8], strides = [1, 1]} : vector<8x64xf32> to vector<1x8xf32>
    %121 = vector.extract_strided_slice %6 {offsets = [7, 16], sizes = [1, 8], strides = [1, 1]} : vector<8x64xf32> to vector<1x8xf32>
    %122 = vector.extract_strided_slice %6 {offsets = [7, 24], sizes = [1, 8], strides = [1, 1]} : vector<8x64xf32> to vector<1x8xf32>
    %123 = vector.extract_strided_slice %6 {offsets = [7, 32], sizes = [1, 8], strides = [1, 1]} : vector<8x64xf32> to vector<1x8xf32>
    %124 = vector.extract_strided_slice %6 {offsets = [7, 40], sizes = [1, 8], strides = [1, 1]} : vector<8x64xf32> to vector<1x8xf32>
    %125 = vector.extract_strided_slice %6 {offsets = [7, 48], sizes = [1, 8], strides = [1, 1]} : vector<8x64xf32> to vector<1x8xf32>
    %126 = vector.extract_strided_slice %6 {offsets = [7, 56], sizes = [1, 8], strides = [1, 1]} : vector<8x64xf32> to vector<1x8xf32>
    %127 = tpu.concatenate %119, %120, %121, %122, %123, %124, %125, %126 in 0 : vector<1x8xf32>, vector<1x8xf32>, vector<1x8xf32>, vector<1x8xf32>, vector<1x8xf32>, vector<1x8xf32>, vector<1x8xf32>, vector<1x8xf32> -> vector<8x8xf32>
    %c0_63 = arith.constant 0 : index
    %c0_64 = arith.constant 0 : index
    %128 = vector.load %arg5[%c0_63, %c0_64] : memref<8x64xf32, #tpu.memory_space<vmem>>, vector<8x64xf32>
    %cst_65 = arith.constant dense<0.000000e+00> : vector<8x64xf32>
    %129 = tpu.matmul %127, %128, %cst_65 {dimension_numbers = #tpu.dot_dimension_numbers<[1], [0], [0], [1], [0, 0, 1, 1], [], []>} : vector<8x8xf32>, vector<8x64xf32>, vector<8x64xf32> -> vector<8x64xf32>
    %c0_66 = arith.constant 0 : index
    %c0_67 = arith.constant 0 : index
    %130 = vector.load %arg4[%c0_66, %c0_67] : memref<64x8xf32, #tpu.memory_space<vmem>>, vector<64x8xf32>
    %cst_68 = arith.constant dense<0.000000e+00> : vector<64x64xf32>
    %131 = tpu.matmul %130, %129, %cst_68 {dimension_numbers = #tpu.dot_dimension_numbers<[1], [0], [0], [1], [0, 0, 1, 1], [], []>} : vector<64x8xf32>, vector<8x64xf32>, vector<64x64xf32> -> vector<64x64xf32>
    %c0_69 = arith.constant 0 : index
    %c448 = arith.constant 448 : index
    %c0_70 = arith.constant 0 : index
    %132 = vector.load %arg6[%c0_69, %c448, %c0_70] : memref<1x512x64xf32, #tpu.memory_space<vmem>>, vector<1x64x64xf32>
    %133 = vector.shape_cast %132 : vector<1x64x64xf32> to vector<64x64xf32>
    %134 = vector.shape_cast %131 : vector<64x64xf32> to vector<1x64x64xf32>
    tpu.vector_store %arg6[%c0_69, %c448, %c0_70], %134 {strides = array<i32>} : memref<1x512x64xf32, #tpu.memory_space<vmem>>, vector<1x64x64xf32>,
    return
  }
  func.func @transform_0(%arg0: i32) -> (i32, i32, i32) {
    %c0_i32 = arith.constant 0 : i32
    %c0_i32_0 = arith.constant 0 : i32
    %c0_i32_1 = arith.constant 0 : i32
    return %arg0, %c0_i32, %c0_i32_0 : i32, i32, i32
  }
  func.func @transform_1(%arg0: i32) -> (i32, i32) {
    %c0_i32 = arith.constant 0 : i32
    %c0_i32_0 = arith.constant 0 : i32
    %c0_i32_1 = arith.constant 0 : i32
    return %c0_i32, %c0_i32_0 : i32, i32
  }
  func.func @transform_2(%arg0: i32) -> (i32, i32) {
    %c0_i32 = arith.constant 0 : i32
    %c0_i32_0 = arith.constant 0 : i32
    %c0_i32_1 = arith.constant 0 : i32
    return %c0_i32, %c0_i32_0 : i32, i32
  }
  func.func @transform_3(%arg0: i32) -> (i32, i32) {
    %c0_i32 = arith.constant 0 : i32
    %c0_i32_0 = arith.constant 0 : i32
    %c0_i32_1 = arith.constant 0 : i32
    return %c0_i32, %c0_i32_0 : i32, i32
  }
  func.func @transform_4(%arg0: i32) -> (i32, i32) {
    %c0_i32 = arith.constant 0 : i32
    %c0_i32_0 = arith.constant 0 : i32
    %c0_i32_1 = arith.constant 0 : i32
    return %c0_i32, %c0_i32_0 : i32, i32
  }
  func.func @transform_5(%arg0: i32) -> (i32, i32, i32) {
    %c0_i32 = arith.constant 0 : i32
    %c0_i32_0 = arith.constant 0 : i32
    %c0_i32_1 = arith.constant 0 : i32
    return %arg0, %c0_i32, %c0_i32_0 : i32, i32, i32
  }
}

</mosaic_0001>

<bundles_post_ra>
// kernel: _lambda_.1
= control target key start
LH: loop header
LB: loop body
LE: loop exit
PB: predicated region body
PF: predicated region fallthrough
CT: control target
= control target key end

     0   :  { %10 = vsyncpa [#allocation3], 0  ;;  %s3639_s0 = inlined_call_operand.vmem [shape: bf16[2,192,64], index: 0, kind: input, shape index: {}]   ;;  %s3640_s1 = inlined_call_operand.vmem [shape: bf16[8,192], index: 1, kind: input, shape index: {}]   ;;  %s3641_s2 = inlined_call_operand.vmem [shape: f32[8,1], index: 2, kind: input, shape index: {}]   ;;  %s3642_s3 = inlined_call_operand.vmem [shape: f32[64,8], index: 3, kind: input, shape index: {}]   ;;  %s3643_s4 = inlined_call_operand.vmem [shape: f32[8,64], index: 4, kind: input, shape index: {}]   ;;  %s3644_s5 = inlined_call_operand.hbm [shape: f32[2,512,64], index: 5, kind: output, shape index: {}]  }
   0x1   :  { %12 = vsyncpa [#allocation3 + $0x1], 0  ;;  %s2965_s18 = smov 0   ;;  %s2967_s19 = smov 0  }
   0x2   :  { %s2969_s20 = smov 0   ;;  %s2971_s21 = smov 0  }
   0x3 LB: > { %s2986_s22 = sadd.s32 4294967295, %s2920_s21   ;;  %s2452_s23 = sadd.s32 4294967294, %s2920_s21   ;;  %s2920_s21 = sphi %s2971_s21, %s3650_s21   ;;  %s2916_s20 = sphi %s2969_s20, %s3649_s20   ;;  %s2912_s19 = sphi %s2967_s19, %s3648_s19   ;;  %s2908_s18 = sphi %s2965_s18, %s3647_s18  }
   0x4   : > { %s2990_s24 = sadd.s32 1, %s2920_s21   ;;  %s135_s25 = sadd.s32 1, %s2916_s20 }
   0x5   : > { %s132_s26 = ssub.s32 %s2920_s21, %s2990_s24  ;;  %p145_p0 = scmp.ne.s32.totalorder %s2916_s20, %s2912_s19 }
   0x6   : > { %p133_p1 = scmp.eq.s32.totalorder %s132_s26, 0  ;;  %p146_p2 = scmp.eq.s32.totalorder %s2986_s22, 1 }
   0x7   : > { %p151_p3 = scmp.ne.s32.totalorder %s2912_s19, %s2908_s18  ;;  %p152_p4 = scmp.eq.s32.totalorder %s2452_s23, 1 }
   0x8   : > { %s3001_s27 = scalar_select %p133_p1, %s2916_s20, %s135_s25  }
   0x9   : > { %p3003_p5 = por %p146_p2, %p145_p0  ;;  %p3007_p6 = por %p152_p4, %p151_p3 }
   0xa   : > { %p2455_p7 = scmp.ge.s32.totalorder %s2920_s21, 1  ;;  %p190_p8 = scmp.lt.s32.totalorder %s2920_s21, 3 }
   0xc   : > { %p191_p9 = pnand %p2455_p7, %p190_p8 }
   0xd   : > { %p218_p10 = scmp.lt.s32.totalorder (!%p191_p9), %s2986_s22, 1  ;;  %v224_v0 = vld [vmem:[%s3640_s1] sm:$0xff] (!%p191_p9)  ;;  %vm333_vm0 = vcmask (!%p191_p9), 523264   ;;  %v2922_v2 = vmov (!%p191_p9), 0   ;;  %v2923_v22 = vmov (!%p191_p9), 0.0   ;;  %s2924_s16 = smov (!%p191_p9), 112  }
   0xe   : > { %194 = sbr.rel (%p191_p9) target bundleno = 2026 (0x7ea), region = 40  ;;  %v249_v1 = vld [vmem:[%s3641_s2] sm:$0xff] (!%p191_p9)  ;;  %337 = vmatprep.subr.bf16.mxu0 (!%p191_p9), %v2922_v2  ;;  %v2459_v3 = vcombine.high (!%p191_p9), %v224_v0, %v224_v0  ;;  %2843 = vset.pattern.permute.xlu0 (!%p191_p9), %v2922_v2  ;;  %v2458_v16 = vcombine.low (!%p191_p9), %v224_v0, %v224_v0  ;;  %s2925_s17 = smov (!%p191_p9), 120   ;;  %vm2926_vm1 = vmmov (!%p191_p9), 0   ;;  %vm406_vm2 = vcmask (!%p191_p9), 1040384   ;;  %v3204_v50 = vld [vmem:[%s3642_s3 + $0x8] sm:$0xff] (!%p191_p9) }
   0xf   : > { %252 = vperm.xlu0 (!%p191_p9), %2843, %v249_v1   ;;  %2639 = vmatprep.subr.mxu1 (!%p191_p9), %v2923_v22  ;;  %v3051_v26 = vld [vmem:[%s3643_s4] sm:$0xff] (!%p191_p9)  ;;  %s2927_s23 = smov (!%p191_p9), 104   ;;  %s2928_s25 = smov (!%p191_p9), 96   ;;  %vm408_vm3 = vcmask (!%p191_p9), 1041408   ;;  %vm410_vm4 = vcmask (!%p191_p9), 1042432   ;;  %vm412_vm5 = vcmask (!%p191_p9), 1043456  }
  0x10   : > { %2472 = vmatprep.mubr.msk.bf16.mxu0 (!%p191_p9), %vm333_vm0, %v2459_v3  ;;  %2640 = vmatpush3.msra.mxu1 (!%p191_p9), %v3051_v26  ;;  %s2929_s26 = smov (!%p191_p9), 88   ;;  %s2930_s30 = smov (!%p191_p9), 80   ;;  %vm414_vm6 = vcmask (!%p191_p9), 1044480   ;;  %vm416_vm7 = vcmask (!%p191_p9), 1045504   ;;  %vm418_vm8 = vcmask (!%p191_p9), 1046528   ;;  %vm421_vm9 = vcmask (!%p191_p9), 64512  }
  0x11   : > { %2641 = vmatprep.mubr.msk.f32.mxu1 (!%p191_p9), %vm2926_vm1, %v2923_v22  ;;  %s2931_s6 = smov (!%p191_p9), 72   ;;  %v3195_v46 = vld [vmem:[%s3642_s3] sm:$0xff] (!%p191_p9)  ;;  %v3209_v52 = vld [vmem:[%s3642_s3 + $0x10] sm:$0xff] (!%p191_p9)  ;;  %v3219_v54 = vld [vmem:[%s3642_s3 + $0x18] sm:$0xff] (!%p191_p9)  ;;  %s215_s7 = sand.u32 (!%p191_p9), 1, %s2912_s19  }
  0x12   : > { %v3225_v55 = vld [vmem:[%s3642_s3 + $0x20] sm:$0xff] (!%p191_p9)  ;;  %v3237_v59 = vld [vmem:[%s3642_s3 + $0x28] sm:$0xff] (!%p191_p9)  ;;  %v3242_v61 = vld [vmem:[%s3642_s3 + $0x30] sm:$0xff] (!%p191_p9)  ;;  %s2456_s8 = sshll.u32 (!%p191_p9), %s215_s7, 9 }
  0x13   : > { %v3253_v1 = vld [vmem:[%s3642_s3 + $0x38] sm:$0xff] (!%p191_p9) }
  0x15   : > { %s219_s9 = scalar_select %p218_p10, %s2986_s22, 1 }
  0x17   : > { %s2791_s10 = smul.u32 96, %s219_s9  ;;  %s3268_s9 = scalar_lea.vmem [#allocation2], %s2456_s8 }
  0x18   : > { %s2390_s11 = sshll.u32 %s3268_s9, 4  ;;  %s3590_s11 = int_to_ptr.vmem [resolvable:$true] %s2390_s11 }
  0x19   : > { %s3025_s13 = scalar_lea.vmem %s3639_s0, %s2791_s10  ;;  %s2550_s10 = sshll.u32 %s2986_s22, 13 }
  0x1a   : > { %v2844_v4 = vld [vmem:[%s3025_s13] sm:$0xff]   ;;  %v2845_v5 = vld [vmem:[%s3025_s13 + $0x8] sm:$0xff]   ;;  %v2846_v6 = vld [vmem:[%s3025_s13 + $0x10] sm:$0xff]   ;;  %s3588_s14 = scalar_lea.hbm %s3644_s5, %s2550_s10  ;;  %s3598_s22 = scalar_lea.sflag [#allocation3], %s215_s7 }
  0x1b   : > { %338 = vmatpush1.bf16.msra.mxu0 %v2844_v4  ;;  %v2847_v7 = vld [vmem:[%s3025_s13 + $0x18] sm:$0xff]   ;;  %v2848_v8 = vld [vmem:[%s3025_s13 + $0x20] sm:$0xff]   ;;  %v2849_v9 = vld [vmem:[%s3025_s13 + $0x28] sm:$0xff]   ;;  %s2858_s15 = scalar_lea.vmem %s3590_s11, 8192 }
  0x1c   : > { %339 = vmatprep.subr.bf16.mxu0 %v2922_v2  ;;  %v2850_v10 = vld [vmem:[%s3025_s13 + $0x30] sm:$0xff]   ;;  %v2851_v11 = vld [vmem:[%s3025_s13 + $0x38] sm:$0xff]   ;;  %v2852_v12 = vld [vmem:[%s3025_s13 + $0x40] sm:$0xff]   ;;  %p2859_p11 = scmp.ne.s32.totalorder %s3590_s11, %s2858_s15 }
  0x1d   : > { %v2853_v13 = vld [vmem:[%s3025_s13 + $0x48] sm:$0xff]   ;;  %v2854_v14 = vld [vmem:[%s3025_s13 + $0x50] sm:$0xff]   ;;  %v2855_v15 = vld [vmem:[%s3025_s13 + $0x58] sm:$0xff]  }
  0x1e   : > { %p2860_p12 = pnand %p2859_p11, %p3003_p5 }
  0x1f   : > { %340 = vmatpush1.bf16.msra.mxu0 %v2845_v5 }
  0x20   : > { %341 = vmatprep.subr.bf16.mxu0 %v2922_v2  ;;  %p2861_p13 = pneg %p2860_p12 }
  0x23   : > { %342 = vmatpush1.bf16.msra.mxu0 %v2846_v6 }
  0x24   : > { %343 = vmatprep.subr.bf16.mxu0 %v2922_v2 }
  0x27   : > { %344 = vmatpush1.bf16.msra.mxu0 %v2847_v7 }
  0x28   : > { %345 = vmatprep.subr.bf16.mxu0 %v2922_v2 }
  0x2b   : > { %346 = vmatpush1.bf16.msra.mxu0 %v2848_v8 }
  0x2c   : > { %347 = vmatprep.subr.bf16.mxu0 %v2922_v2 }
  0x2f   : > { %348 = vmatpush1.bf16.msra.mxu0 %v2849_v9 }
  0x30   : > { %349 = vmatprep.subr.bf16.mxu0 %v2922_v2 }
  0x33   : > { %350 = vmatpush1.bf16.msra.mxu0 %v2850_v10 }
  0x34   : > { %351 = vmatprep.subr.bf16.mxu0 %v2922_v2 }
  0x37   : > { %352 = vmatpush1.bf16.msra.mxu0 %v2851_v11 }
  0x38   : > { %353 = vmatprep.subr.bf16.mxu0 %v2922_v2 }
  0x3b   : > { %354 = vmatpush1.bf16.msra.mxu0 %v2852_v12 }
  0x3c   : > { %355 = vmatprep.subr.bf16.mxu0 %v2922_v2 }
  0x3f   : > { %356 = vmatpush1.bf16.msra.mxu0 %v2853_v13 }
  0x40   : > { %357 = vmatprep.subr.bf16.mxu0 %v2922_v2 }
  0x43   : > { %358 = vmatpush1.bf16.msra.mxu0 %v2854_v14 }
  0x44   : > { %359 = vmatprep.subr.bf16.mxu0 %v2922_v2 }
  0x47   : > { %360 = vmatpush1.bf16.msra.mxu0 %v2855_v15 }
  0x4a   : > { %370 = vmatmul.mubr.bf16.vlgmr.msra.gmra.mrb[0].mxu0 %v2458_v16 }
  0x4b   : > { %2703 = vmatprep.mubr.msk.f32.mxu0 %vm421_vm9, %v3195_v46 }
  0x8e   : > { %v253_v17 = vpop.permute.xlu0 %252 }
 0x11d   : > { %v371_v18 = vpop.f32.mrb[0].mxu0 }
 0x11e   : > { %v3039_v19 = vadd.f32 %v371_v18, %v253_v17  ;;  %v373_v20 = vpop.f32.mrb[1].mxu0 }
 0x11f   : > { %v374_v21 = vpop.f32.mrb[2].mxu0 }
 0x120   : > { %v375_v23 = vpop.f32.mrb[3].mxu0  ;;  %v3043_v24 = vrot.slane %v3039_v19, 6  ;;  %v3046_v25 = vrot.slane %v3039_v19, 7  ;;  %v3061_v27 = vrot.slane %v3039_v19, 5  ;;  %v3064_v28 = vrot.slane %v3039_v19, 4 }
 0x121   : > { %v3071_v29 = vrot.slane %v3039_v19, 3  ;;  %v3074_v30 = vrot.slane %v3039_v19, 2  ;;  %v3081_v31 = vrot.slane %v3039_v19, 1 }
 0x122   : > { %383 = vrot.lane.b32.xlu1 %v3043_v24, %s2924_s16  ;;  %379 = vrot.lane.b32.xlu0 %v3046_v25, %s2925_s17 }
 0x126   : > { %387 = vrot.lane.b32.xlu1 %v3061_v27, %s2927_s23  ;;  %391 = vrot.lane.b32.xlu0 %v3064_v28, %s2928_s25 }
 0x12a   : > { %395 = vrot.lane.b32.xlu1 %v3071_v29, %s2929_s26  ;;  %399 = vrot.lane.b32.xlu0 %v3074_v30, %s2930_s30 }
 0x12e   : > { %403 = vrot.lane.b32.xlu1 %v3081_v31, %s2931_s6  ;;  %641 = vrot.lane.b32.xlu0 %v3039_v19, %s2925_s17 }
 0x132   : > { %644 = vrot.lane.b32.xlu1 %v3046_v25, %s2924_s16  ;;  %647 = vrot.lane.b32.xlu0 %v3043_v24, %s2927_s23 }
 0x136   : > { %650 = vrot.lane.b32.xlu1 %v3061_v27, %s2928_s25  ;;  %653 = vrot.lane.b32.xlu0 %v3064_v28, %s2929_s26 }
 0x13a   : > { %656 = vrot.lane.b32.xlu1 %v3071_v29, %s2930_s30  ;;  %659 = vrot.lane.b32.xlu0 %v3074_v30, %s2931_s6 }
 0x13e   : > { %889 = vrot.lane.b32.xlu1 %v3081_v31, %s2925_s17  ;;  %892 = vrot.lane.b32.xlu0 %v3039_v19, %s2924_s16 }
 0x142   : > { %895 = vrot.lane.b32.xlu1 %v3046_v25, %s2927_s23  ;;  %898 = vrot.lane.b32.xlu0 %v3043_v24, %s2928_s25 }
 0x146   : > { %901 = vrot.lane.b32.xlu1 %v3061_v27, %s2929_s26  ;;  %904 = vrot.lane.b32.xlu0 %v3064_v28, %s2930_s30 }
 0x14a   : > { %907 = vrot.lane.b32.xlu1 %v3071_v29, %s2931_s6  ;;  %1143 = vrot.lane.b32.xlu0 %v3039_v19, %s2927_s23 }
 0x14e   : > { %1140 = vrot.lane.b32.xlu1 %v3081_v31, %s2924_s16  ;;  %1394 = vrot.lane.b32.xlu0 %v3039_v19, %s2928_s25 }
 0x152   : > { %1146 = vrot.lane.b32.xlu1 %v3046_v25, %s2928_s25  ;;  %1137 = vrot.lane.b32.xlu0 %v3074_v30, %s2925_s17 }
 0x156   : > { %1385 = vrot.lane.b32.xlu1 %v3071_v29, %s2925_s17  ;;  %1149 = vrot.lane.b32.xlu0 %v3043_v24, %s2929_s26 }
 0x15a   : > { %1388 = vrot.lane.b32.xlu1 %v3074_v30, %s2924_s16  ;;  %1152 = vrot.lane.b32.xlu0 %v3061_v27, %s2930_s30 }
 0x15e   : > { %1391 = vrot.lane.b32.xlu1 %v3081_v31, %s2927_s23  ;;  %1155 = vrot.lane.b32.xlu0 %v3064_v28, %s2931_s6 }
 0x162   : > { %1397 = vrot.lane.b32.xlu1 %v3046_v25, %s2929_s26  ;;  %1400 = vrot.lane.b32.xlu0 %v3043_v24, %s2930_s30 }
 0x166   : > { %1403 = vrot.lane.b32.xlu1 %v3061_v27, %s2931_s6  ;;  %1645 = vrot.lane.b32.xlu0 %v3039_v19, %s2929_s26 }
 0x16a   : > { %1636 = vrot.lane.b32.xlu1 %v3071_v29, %s2924_s16  ;;  %1633 = vrot.lane.b32.xlu0 %v3064_v28, %s2925_s17 }
 0x16e   : > { %1642 = vrot.lane.b32.xlu1 %v3081_v31, %s2928_s25  ;;  %1639 = vrot.lane.b32.xlu0 %v3074_v30, %s2927_s23 }
 0x172   : > { %1648 = vrot.lane.b32.xlu1 %v3046_v25, %s2930_s30  ;;  %1651 = vrot.lane.b32.xlu0 %v3043_v24, %s2931_s6 }
 0x176   : > { %1896 = vrot.lane.b32.xlu1 %v3039_v19, %s2930_s30  ;;  %2129 = vrot.lane.b32.xlu0 %v3043_v24, %s2925_s17 }
 0x17a   : > { %1881 = vrot.lane.b32.xlu1 %v3061_v27, %s2925_s17  ;;  %2132 = vrot.lane.b32.xlu0 %v3061_v27, %s2924_s16 }
 0x17e   : > { %1884 = vrot.lane.b32.xlu1 %v3064_v28, %s2924_s16  ;;  %2135 = vrot.lane.b32.xlu0 %v3064_v28, %s2927_s23  ;;  %s2932_s16 = smov [#allocation2]  }
 0x17f   : > { %s2862_s17 = sshll.u32 %s2932_s16, 4  ;;  %s2863_s17 = int_to_ptr.vmem [resolvable:$false] %s2862_s17 }
 0x180   : > { %p2865_p0 = scmp.lt.s32.totalorder %s3590_s11, %s2863_s17 }
 0x182   : > { %1887 = vrot.lane.b32.xlu1 %v3071_v29, %s2927_s23  ;;  %2138 = vrot.lane.b32.xlu0 %v3071_v29, %s2928_s25  ;;  %s2864_s23 = scalar_lea.vmem %s2863_s17, 16384 }
 0x183   : > { %p2866_p1 = scmp.lt.s32.totalorder %s2864_s23, %s2858_s15 }
 0x185   : > { %p2867_p2 = por %p2866_p1, %p2865_p0 }
 0x186   : > { %1890 = vrot.lane.b32.xlu1 %v3074_v30, %s2928_s25  ;;  %2141 = vrot.lane.b32.xlu0 %v3074_v30, %s2929_s26 }
 0x187   : > { %p2868_p3 = pnand %p2867_p2, %p2861_p13 }
 0x18a   : > { %1893 = vrot.lane.b32.xlu1 %v3081_v31, %s2929_s26  ;;  %2144 = vrot.lane.b32.xlu0 %v3081_v31, %s2930_s30 }
 0x18e   : > { %1899 = vrot.lane.b32.xlu1 %v3046_v25, %s2931_s6  ;;  %2147 = vrot.lane.b32.xlu0 %v3039_v19, %s2931_s6 }
 0x194   : > { %v384_v32 = vpop.permute.xlu1 %383  ;;  %v380_v33 = vpop.permute.xlu0 %379 }
 0x195   : > { %v407_v34 = vsel %vm406_vm2, %v3039_v19, %v380_v33 }
 0x196   : > { %v409_v36 = vsel %vm408_vm3, %v407_v34, %v384_v32 }
 0x198   : > { %v388_v35 = vpop.permute.xlu1 %387  ;;  %v392_v37 = vpop.permute.xlu0 %391 }
 0x199   : > { %v411_v38 = vsel %vm410_vm4, %v409_v36, %v388_v35 }
 0x19a   : > { %v413_v39 = vsel %vm412_vm5, %v411_v38, %v392_v37 }
 0x19c   : > { %v396_v40 = vpop.permute.xlu1 %395  ;;  %v400_v42 = vpop.permute.xlu0 %399 }
 0x19d   : > { %v415_v41 = vsel %vm414_vm6, %v413_v39, %v396_v40 }
 0x19e   : > { %v417_v43 = vsel %vm416_vm7, %v415_v41, %v400_v42 }
 0x1a0   : > { %v404_v44 = vpop.permute.xlu1 %403  ;;  %v642_v47 = vpop.permute.xlu0 %641 }
 0x1a1   : > { %v419_v45 = vsel %vm418_vm8, %v417_v43, %v404_v44  ;;  %v662_v56 = vsel %vm406_vm2, %v3081_v31, %v642_v47 }
 0x1a2   : > { %2642 = vmatmul.mubr.msk.f32.vlgmr.msra.gmra.mrb[0].mxu1 %vm421_vm9, %v419_v45 }
 0x1a3   : > { %2646 = vmatprep.mubr.msk.f32.mxu1 %vm421_vm9, %v3195_v46 }
 0x1a4   : > { %v645_v48 = vpop.permute.xlu1 %644  ;;  %v648_v53 = vpop.permute.xlu0 %647 }
 0x1a5   : > { %v663_v58 = vsel %vm408_vm3, %v662_v56, %v645_v48 }
 0x1a6   : > { %v664_v62 = vsel %vm410_vm4, %v663_v58, %v648_v53 }
 0x1a8   : > { %v651_v57 = vpop.permute.xlu1 %650  ;;  %v654_v60 = vpop.permute.xlu0 %653 }
 0x1a9   : > { %v665_v63 = vsel %vm412_vm5, %v664_v62, %v651_v57 }
 0x1aa   : > { %v666_v2 = vsel %vm414_vm6, %v665_v63, %v654_v60 }
 0x1ac   : > { %v657_v0 = vpop.permute.xlu1 %656  ;;  %v660_v4 = vpop.permute.xlu0 %659 }
 0x1ad   : > { %v667_v3 = vsel %vm416_vm7, %v666_v2, %v657_v0 }
 0x1ae   : > { %v668_v5 = vsel %vm418_vm8, %v667_v3, %v660_v4 }
 0x1b0   : > { %v890_v13 = vpop.permute.xlu1 %889  ;;  %v893_v17 = vpop.permute.xlu0 %892 }
 0x1b1   : > { %v910_v19 = vsel %vm406_vm2, %v3074_v30, %v890_v13 }
 0x1b2   : > { %v911_v21 = vsel %vm408_vm3, %v910_v19, %v893_v17 }
 0x1b4   : > { %v896_v18 = vpop.permute.xlu1 %895  ;;  %v899_v20 = vpop.permute.xlu0 %898 }
 0x1b5   : > { %v912_v31 = vsel %vm410_vm4, %v911_v21, %v896_v18 }
 0x1b6   : > { %v913_v30 = vsel %vm412_vm5, %v912_v31, %v899_v20 }
 0x1b8   : > { %v902_v23 = vpop.permute.xlu1 %901  ;;  %v905_v33 = vpop.permute.xlu0 %904 }
 0x1b9   : > { %v914_v32 = vsel %vm414_vm6, %v913_v30, %v902_v23 }
 0x1ba   : > { %v915_v35 = vsel %vm416_vm7, %v914_v32, %v905_v33 }
 0x1bc   : > { %v908_v34 = vpop.permute.xlu1 %907  ;;  %v1144_v37 = vpop.permute.xlu0 %1143 }
 0x1bd   : > { %v916_v36 = vsel %vm418_vm8, %v915_v35, %v908_v34 }
 0x1c0   : > { %v1141_v38 = vpop.permute.xlu1 %1140  ;;  %v1395_v41 = vpop.permute.xlu0 %1394 }
 0x1c4   : > { %v1147_v43 = vpop.permute.xlu1 %1146  ;;  %v1138_v48 = vpop.permute.xlu0 %1137 }
 0x1c5   : > { %v1158_v62 = vsel %vm406_vm2, %v3071_v29, %v1138_v48 }
 0x1c6   : > { %v1159_v0 = vsel %vm408_vm3, %v1158_v62, %v1141_v38 }
 0x1c7   : > { %v1160_v3 = vsel %vm410_vm4, %v1159_v0, %v1144_v37 }
 0x1c8   : > { %v1150_v56 = vpop.permute.xlu0 %1149 }
 0x1cc   : > { %v1153_v63 = vpop.permute.xlu0 %1152 }
 0x1d0   : > { %v1156_v4 = vpop.permute.xlu0 %1155 }
 0x1d4   : > { %v1401_v13 = vpop.permute.xlu0 %1400 }
 0x1d8   : > { %v1646_v35 = vpop.permute.xlu0 %1645 }
 0x275   : > { %v491_v49 = vpop.f32.mrb[0].mxu1 }
 0x276   : > { %v2643_v51 = vpop.f32.mrb[1].mxu1  ;;  %2644 = vmatprep.subr.mxu1 %v491_v49 }
 0x277   : > { %2645 = vmatpush3.msra.mxu1 %v491_v49  ;;  %v1386_v49 = vpop.permute.xlu1 %1385 }
 0x278   : > { %2647 = vmatmul.mubr.msk.f32.vlgmr.msra.gmra.mrb[2].mxu1 %vm421_vm9, %v3204_v50  ;;  %2658 = vmatprep.subr.mxu1 %v2923_v22  ;;  %v1406_v29 = vsel %vm406_vm2, %v3064_v28, %v1386_v49 }
 0x279   : > { %2649 = vmatprep.mubr.msk.f32.mxu1 %vm421_vm9, %v3209_v52  ;;  %2659 = vmatpush3.msra.mxu1 %v3051_v26 }
 0x27b   : > { %v1389_v58 = vpop.permute.xlu1 %1388 }
 0x27c   : > { %2650 = vmatmul.mubr.msk.f32.gmra.mrb[4].mxu1 %vm421_vm9, %v3219_v54 }
 0x27d   : > { %2652 = vmatprep.mubr.msk.f32.mxu1 %vm421_vm9, %v3225_v55 }
 0x27f   : > { %v1392_v2 = vpop.permute.xlu1 %1391 }
 0x280   : > { %2653 = vmatmul.mubr.msk.f32.gmra.mrb[6].mxu1 %vm421_vm9, %v3237_v59 }
 0x281   : > { %2655 = vmatprep.mubr.msk.f32.mxu1 %vm421_vm9, %v3242_v61 }
 0x284   : > { %2656 = vmatmul.mubr.msk.f32.gmra.mrb[8].mxu1 %vm421_vm9, %v3253_v1 }
 0x285   : > { %2660 = vmatprep.mubr.msk.f32.mxu1 %vm2926_vm1, %v2923_v22 }
 0x288   : > { %2661 = vmatmul.mubr.msk.f32.vlgmr.msra.gmra.mrb[10].mxu1 %vm421_vm9, %v668_v5  ;;  %v1161_v5 = vsel %vm412_vm5, %v1160_v3, %v1147_v43 }
 0x289   : > { %2665 = vmatprep.mubr.msk.f32.mxu1 %vm421_vm9, %v3195_v46 }
 0x34b   : > { %v2648_v6 = vpop.f32.mrb[2].mxu1 }
 0x34c   : > { %633 = vst.msk [vmem:[%s3268_s9 + $0x8] sm:$0xff] %vm333_vm0, %v2648_v6  ;;  %v593_v7 = vpop.f32.mrb[3].mxu1  ;;  %v1407_v6 = vsel %vm408_vm3, %v1406_v29, %v1389_v58 }
 0x34d   : > { %632 = vst.msk [vmem:[%s3268_s9] sm:$0xff] %vm333_vm0, %v593_v7  ;;  %v1398_v7 = vpop.permute.xlu1 %1397 }
 0x34f   : > { %v2651_v8 = vpop.f32.mrb[4].mxu1 }
 0x350   : > { %635 = vst.msk [vmem:[%s3268_s9 + $0x18] sm:$0xff] %vm333_vm0, %v2651_v8  ;;  %v603_v9 = vpop.f32.mrb[5].mxu1  ;;  %v1408_v8 = vsel %vm410_vm4, %v1407_v6, %v1392_v2 }
 0x351   : > { %634 = vst.msk [vmem:[%s3268_s9 + $0x10] sm:$0xff] %vm333_vm0, %v603_v9  ;;  %v1162_v9 = vsel %vm414_vm6, %v1161_v5, %v1150_v56 }
 0x352   : > { %v1163_v28 = vsel %vm416_vm7, %v1162_v9, %v1153_v63 }
 0x353   : > { %v2654_v10 = vpop.f32.mrb[6].mxu1 }
 0x354   : > { %637 = vst.msk [vmem:[%s3268_s9 + $0x28] sm:$0xff] %vm333_vm0, %v2654_v10  ;;  %v613_v11 = vpop.f32.mrb[7].mxu1  ;;  %v1409_v10 = vsel %vm412_vm5, %v1408_v8, %v1395_v41 }
 0x355   : > { %636 = vst.msk [vmem:[%s3268_s9 + $0x20] sm:$0xff] %vm333_vm0, %v613_v11  ;;  %v1164_v11 = vsel %vm418_vm8, %v1163_v28, %v1156_v4 }
 0x357   : > { %v2657_v12 = vpop.f32.mrb[8].mxu1 }
 0x358   : > { %639 = vst.msk [vmem:[%s3268_s9 + $0x38] sm:$0xff] %vm333_vm0, %v2657_v12  ;;  %v623_v14 = vpop.f32.mrb[9].mxu1  ;;  %v1410_v12 = vsel %vm414_vm6, %v1409_v10, %v1398_v7 }
 0x359   : > { %638 = vst.msk [vmem:[%s3268_s9 + $0x30] sm:$0xff] %vm333_vm0, %v623_v14  ;;  %v1404_v14 = vpop.permute.xlu1 %1403 }
 0x35b   : > { %v739_v15 = vpop.f32.mrb[10].mxu1 }
 0x35c   : > { %v2662_v16 = vpop.f32.mrb[11].mxu1  ;;  %2663 = vmatprep.subr.mxu1 %v739_v15 }
 0x35d   : > { %2664 = vmatpush3.msra.mxu1 %v739_v15  ;;  %v1411_v15 = vsel %vm416_vm7, %v1410_v12, %v1401_v13  ;;  %v1637_v17 = vpop.permute.xlu1 %1636 }
 0x35e   : > { %2666 = vmatmul.mubr.msk.f32.vlgmr.msra.gmra.mrb[12].mxu1 %vm421_vm9, %v3204_v50  ;;  %2677 = vmatprep.subr.mxu1 %v2923_v22  ;;  %v1412_v16 = vsel %vm418_vm8, %v1411_v15, %v1404_v14 }
 0x35f   : > { %2668 = vmatprep.mubr.msk.f32.mxu1 %vm421_vm9, %v3209_v52  ;;  %2678 = vmatpush3.msra.mxu1 %v3051_v26 }
 0x361   : > { %v1643_v18 = vpop.permute.xlu1 %1642 }
 0x362   : > { %2669 = vmatmul.mubr.msk.f32.gmra.mrb[14].mxu1 %vm421_vm9, %v3219_v54 }
 0x363   : > { %2671 = vmatprep.mubr.msk.f32.mxu1 %vm421_vm9, %v3225_v55 }
 0x365   : > { %v1649_v19 = vpop.permute.xlu1 %1648 }
 0x366   : > { %2672 = vmatmul.mubr.msk.f32.gmra.mrb[16].mxu1 %vm421_vm9, %v3237_v59 }
 0x367   : > { %2674 = vmatprep.mubr.msk.f32.mxu1 %vm421_vm9, %v3242_v61 }
 0x369   : > { %v3377_v23 = vpop.permute.xlu1 %1896 }
 0x36a   : > { %2675 = vmatmul.mubr.msk.f32.gmra.mrb[18].mxu1 %vm421_vm9, %v3253_v1 }
 0x36b   : > { %2679 = vmatprep.mubr.msk.f32.mxu1 %vm2926_vm1, %v2923_v22 }
 0x36d   : > { %v1882_v33 = vpop.permute.xlu1 %1881 }
 0x36e   : > { %2680 = vmatmul.mubr.msk.f32.vlgmr.msra.gmra.mrb[20].mxu1 %vm421_vm9, %v916_v36 }
 0x36f   : > { %2684 = vmatprep.mubr.msk.f32.mxu1 %vm421_vm9, %v3195_v46 }
 0x371   : > { %v1885_v38 = vpop.permute.xlu1 %1884 }
 0x375   : > { %v1888_v43 = vpop.permute.xlu1 %1887 }
 0x379   : > { %v1891_v49 = vpop.permute.xlu1 %1890 }
 0x37d   : > { %v1894_v56 = vpop.permute.xlu1 %1893 }
 0x381   : > { %v1900_v3 = vpop.permute.xlu1 %1899 }
 0x431   : > { %v2667_v39 = vpop.f32.mrb[12].mxu1 }
 0x432   : > { %881 = vst.msk [vmem:[%s3268_s9 + $0x48] sm:$0xff] %vm333_vm0, %v2667_v39  ;;  %v841_v40 = vpop.f32.mrb[13].mxu1 }
 0x433   : > { %880 = vst.msk [vmem:[%s3268_s9 + $0x40] sm:$0xff] %vm333_vm0, %v841_v40  ;;  %v1634_v40 = vpop.permute.xlu0 %1633 }
 0x435   : > { %v2670_v42 = vpop.f32.mrb[14].mxu1 }
 0x436   : > { %883 = vst.msk [vmem:[%s3268_s9 + $0x58] sm:$0xff] %vm333_vm0, %v2670_v42  ;;  %v851_v44 = vpop.f32.mrb[15].mxu1 }
 0x437   : > { %882 = vst.msk [vmem:[%s3268_s9 + $0x50] sm:$0xff] %vm333_vm0, %v851_v44 }
 0x439   : > { %v2673_v45 = vpop.f32.mrb[16].mxu1 }
 0x43a   : > { %885 = vst.msk [vmem:[%s3268_s9 + $0x68] sm:$0xff] %vm333_vm0, %v2673_v45  ;;  %v861_v47 = vpop.f32.mrb[17].mxu1  ;;  %v1654_v45 = vsel %vm406_vm2, %v3061_v27, %v1634_v40 }
 0x43b   : > { %884 = vst.msk [vmem:[%s3268_s9 + $0x60] sm:$0xff] %vm333_vm0, %v861_v47  ;;  %v1640_v47 = vpop.permute.xlu0 %1639  ;;  %v1655_v48 = vsel %vm408_vm3, %v1654_v45, %v1637_v17 }
 0x43c   : > { %v1656_v27 = vsel %vm410_vm4, %v1655_v48, %v1640_v47 }
 0x43d   : > { %v2676_v51 = vpop.f32.mrb[18].mxu1 }
 0x43e   : > { %887 = vst.msk [vmem:[%s3268_s9 + $0x78] sm:$0xff] %vm333_vm0, %v2676_v51  ;;  %v871_v53 = vpop.f32.mrb[19].mxu1  ;;  %v1657_v51 = vsel %vm412_vm5, %v1656_v27, %v1643_v18 }
 0x43f   : > { %886 = vst.msk [vmem:[%s3268_s9 + $0x70] sm:$0xff] %vm333_vm0, %v871_v53  ;;  %v1658_v53 = vsel %vm414_vm6, %v1657_v51, %v1646_v35 }
 0x440   : > { %v1659_v58 = vsel %vm416_vm7, %v1658_v53, %v1649_v19 }
 0x441   : > { %v987_v57 = vpop.f32.mrb[20].mxu1 }
 0x442   : > { %v2681_v60 = vpop.f32.mrb[21].mxu1  ;;  %2682 = vmatprep.subr.mxu1 %v987_v57 }
 0x443   : > { %2683 = vmatpush3.msra.mxu1 %v987_v57  ;;  %v1902_v57 = vsel %vm406_vm2, %v3043_v24, %v1882_v33  ;;  %v1652_v60 = vpop.permute.xlu0 %1651 }
 0x444   : > { %2685 = vmatmul.mubr.msk.f32.vlgmr.msra.gmra.mrb[22].mxu1 %vm421_vm9, %v3204_v50  ;;  %2696 = vmatprep.subr.mxu1 %v2923_v22  ;;  %v1903_v62 = vsel %vm408_vm3, %v1902_v57, %v1885_v38  ;;  %v1660_v0 = vsel %vm418_vm8, %v1659_v58, %v1652_v60 }
 0x445   : > { %2687 = vmatprep.mubr.msk.f32.mxu1 %vm421_vm9, %v3209_v52  ;;  %2697 = vmatpush3.msra.mxu1 %v3051_v26  ;;  %v1904_v63 = vsel %vm410_vm4, %v1903_v62, %v1888_v43 }
 0x446   : > { %2715 = vmatprep.subr.mxu1 %v2923_v22  ;;  %v1905_v24 = vsel %vm412_vm5, %v1904_v63, %v1891_v49 }
 0x447   : > { %v1906_v2 = vsel %vm414_vm6, %v1905_v24, %v1894_v56  ;;  %v2130_v5 = vpop.permute.xlu0 %2129 }
 0x448   : > { %2688 = vmatmul.mubr.msk.f32.gmra.mrb[24].mxu1 %vm421_vm9, %v3219_v54  ;;  %v1907_v29 = vsel %vm416_vm7, %v1906_v2, %v3377_v23 }
 0x449   : > { %2690 = vmatprep.mubr.msk.f32.mxu1 %vm421_vm9, %v3225_v55  ;;  %v1908_v4 = vsel %vm418_vm8, %v1907_v29, %v1900_v3 }
 0x44b   : > { %v2133_v9 = vpop.permute.xlu0 %2132 }
 0x44c   : > { %2691 = vmatmul.mubr.msk.f32.gmra.mrb[26].mxu1 %vm421_vm9, %v3237_v59 }
 0x44d   : > { %2693 = vmatprep.mubr.msk.f32.mxu1 %vm421_vm9, %v3242_v61 }
 0x44f   : > { %v2136_v15 = vpop.permute.xlu0 %2135 }
 0x450   : > { %2694 = vmatmul.mubr.msk.f32.gmra.mrb[28].mxu1 %vm421_vm9, %v3253_v1 }
 0x451   : > { %2698 = vmatprep.mubr.msk.f32.mxu1 %vm2926_vm1, %v2923_v22 }
 0x453   : > { %v2139_v23 = vpop.permute.xlu0 %2138 }
 0x454   : > { %2699 = vmatmul.mubr.msk.f32.vlgmr.msra.gmra.mrb[30].mxu1 %vm421_vm9, %v1164_v11 }
 0x455   : > { %2716 = vmatpush3.msra.mxu1 %v3051_v26  ;;  %2717 = vmatprep.mubr.msk.f32.mxu1 %vm2926_vm1, %v2923_v22 }
 0x457   : > { %v2142_v33 = vpop.permute.xlu0 %2141 }
 0x458   : > { %2718 = vmatmul.mubr.msk.f32.vlgmr.msra.gmra.mrb[32].mxu1 %vm421_vm9, %v1412_v16 }
 0x459   : > { %2722 = vmatprep.mubr.msk.f32.mxu1 %vm421_vm9, %v3195_v46 }
 0x517   : > { %v2686_v20 = vpop.f32.mrb[22].mxu1 }
 0x518   : > { %1129 = vst.msk [vmem:[%s3268_s9 + $0x88] sm:$0xff] %vm333_vm0, %v2686_v20  ;;  %v1089_v21 = vpop.f32.mrb[23].mxu1 }
 0x519   : > { %1128 = vst.msk [vmem:[%s3268_s9 + $0x80] sm:$0xff] %vm333_vm0, %v1089_v21 }
 0x51b   : > { %v2689_v31 = vpop.f32.mrb[24].mxu1 }
 0x51c   : > { %1131 = vst.msk [vmem:[%s3268_s9 + $0x98] sm:$0xff] %vm333_vm0, %v2689_v31  ;;  %v1099_v30 = vpop.f32.mrb[25].mxu1 }
 0x51d   : > { %1130 = vst.msk [vmem:[%s3268_s9 + $0x90] sm:$0xff] %vm333_vm0, %v1099_v30 }
 0x51f   : > { %v2692_v32 = vpop.f32.mrb[26].mxu1 }
 0x520   : > { %1133 = vst.msk [vmem:[%s3268_s9 + $0xa8] sm:$0xff] %vm333_vm0, %v2692_v32  ;;  %v1109_v34 = vpop.f32.mrb[27].mxu1 }
 0x521   : > { %1132 = vst.msk [vmem:[%s3268_s9 + $0xa0] sm:$0xff] %vm333_vm0, %v1109_v34 }
 0x523   : > { %v2695_v36 = vpop.f32.mrb[28].mxu1 }
 0x524   : > { %1135 = vst.msk [vmem:[%s3268_s9 + $0xb8] sm:$0xff] %vm333_vm0, %v2695_v36  ;;  %v1119_v37 = vpop.f32.mrb[29].mxu1  ;;  %v2145_v36 = vpop.permute.xlu0 %2144 }
 0x525   : > { %1134 = vst.msk [vmem:[%s3268_s9 + $0xb0] sm:$0xff] %vm333_vm0, %v1119_v37 }
 0x527   : > { %v1235_v39 = vpop.f32.mrb[30].mxu1 }
 0x528   : > { %v2700_v41 = vpop.f32.mrb[31].mxu1  ;;  %2701 = vmatprep.subr.mxu0 %v1235_v39  ;;  %v2148_v40 = vpop.permute.xlu0 %2147 }
 0x529   : > { %2702 = vmatpush3.msra.mxu0 %v1235_v39 }
 0x52a   : > { %2704 = vmatmul.mubr.msk.f32.vlgmr.msra.gmra.mrb[4].mxu0 %vm421_vm9, %v3204_v50 }
 0x52b   : > { %v1483_v42 = vpop.f32.mrb[32].mxu1  ;;  %2706 = vmatprep.mubr.msk.f32.mxu0 %vm421_vm9, %v3209_v52 }
 0x52c   : > { %v2719_v44 = vpop.f32.mrb[33].mxu1  ;;  %2720 = vmatprep.subr.mxu1 %v1483_v42 }
 0x52d   : > { %2721 = vmatpush3.msra.mxu1 %v1483_v42 }
 0x52e   : > { %2723 = vmatmul.mubr.msk.f32.vlgmr.msra.gmra.mrb[34].mxu1 %vm421_vm9, %v3204_v50  ;;  %2734 = vmatprep.subr.mxu1 %v2923_v22 }
 0x52f   : > { %2725 = vmatprep.mubr.msk.f32.mxu1 %vm421_vm9, %v3209_v52  ;;  %2735 = vmatpush3.msra.mxu1 %v3051_v26 }
 0x530   : > { %2753 = vmatprep.subr.mxu1 %v2923_v22  ;;  %2707 = vmatmul.mubr.msk.f32.gmra.mrb[6].mxu0 %vm421_vm9, %v3219_v54 }
 0x531   : > { %2709 = vmatprep.mubr.msk.f32.mxu0 %vm421_vm9, %v3225_v55 }
 0x532   : > { %2726 = vmatmul.mubr.msk.f32.gmra.mrb[36].mxu1 %vm421_vm9, %v3219_v54 }
 0x533   : > { %2728 = vmatprep.mubr.msk.f32.mxu1 %vm421_vm9, %v3225_v55 }
 0x534   : > { %2710 = vmatmul.mubr.msk.f32.gmra.mrb[8].mxu0 %vm421_vm9, %v3237_v59 }
 0x535   : > { %2712 = vmatprep.mubr.msk.f32.mxu0 %vm421_vm9, %v3242_v61 }
 0x536   : > { %2729 = vmatmul.mubr.msk.f32.gmra.mrb[38].mxu1 %vm421_vm9, %v3237_v59 }
 0x537   : > { %2731 = vmatprep.mubr.msk.f32.mxu1 %vm421_vm9, %v3242_v61 }
 0x538   : > { %2713 = vmatmul.mubr.msk.f32.gmra.mrb[10].mxu0 %vm421_vm9, %v3253_v1 }
 0x539   : > { %2741 = vmatprep.mubr.msk.f32.mxu0 %vm421_vm9, %v3195_v46 }
 0x53a   : > { %2732 = vmatmul.mubr.msk.f32.gmra.mrb[40].mxu1 %vm421_vm9, %v3253_v1 }
 0x53b   : > { %2736 = vmatprep.mubr.msk.f32.mxu1 %vm2926_vm1, %v2923_v22 }
 0x53e   : > { %2737 = vmatmul.mubr.msk.f32.vlgmr.msra.gmra.mrb[42].mxu1 %vm421_vm9, %v1660_v0 }
 0x53f   : > { %2754 = vmatpush3.msra.mxu1 %v3051_v26  ;;  %2755 = vmatprep.mubr.msk.f32.mxu1 %vm2926_vm1, %v2923_v22 }
 0x542   : > { %2756 = vmatmul.mubr.msk.f32.vlgmr.msra.gmra.mrb[44].mxu1 %vm421_vm9, %v1908_v4 }
 0x543   : > { %2760 = vmatprep.mubr.msk.f32.mxu1 %vm421_vm9, %v3195_v46 }
 0x5fd   : > { %v2705_v6 = vpop.f32.mrb[4].mxu0 }
 0x5fe   : > { %1377 = vst.msk [vmem:[%s3268_s9 + $0xc8] sm:$0xff] %vm333_vm0, %v2705_v6  ;;  %v1337_v7 = vpop.f32.mrb[5].mxu0 }
 0x5ff   : > { %1376 = vst.msk [vmem:[%s3268_s9 + $0xc0] sm:$0xff] %vm333_vm0, %v1337_v7 }
 0x601   : > { %v2724_v8 = vpop.f32.mrb[34].mxu1 }
 0x602   : > { %1625 = vst.msk [vmem:[%s3268_s9 + $0x108] sm:$0xff] %vm333_vm0, %v2724_v8  ;;  %v1585_v28 = vpop.f32.mrb[35].mxu1 }
 0x603   : > { %1624 = vst.msk [vmem:[%s3268_s9 + $0x100] sm:$0xff] %vm333_vm0, %v1585_v28  ;;  %v2708_v10 = vpop.f32.mrb[6].mxu0 }
 0x604   : > { %1379 = vst.msk [vmem:[%s3268_s9 + $0xd8] sm:$0xff] %vm333_vm0, %v2708_v10  ;;  %v1347_v11 = vpop.f32.mrb[7].mxu0 }
 0x605   : > { %v2727_v12 = vpop.f32.mrb[36].mxu1  ;;  %1378 = vst.msk [vmem:[%s3268_s9 + $0xd0] sm:$0xff] %vm333_vm0, %v1347_v11 }
 0x606   : > { %1627 = vst.msk [vmem:[%s3268_s9 + $0x118] sm:$0xff] %vm333_vm0, %v2727_v12  ;;  %v1595_v13 = vpop.f32.mrb[37].mxu1 }
 0x607   : > { %1626 = vst.msk [vmem:[%s3268_s9 + $0x110] sm:$0xff] %vm333_vm0, %v1595_v13  ;;  %v2711_v14 = vpop.f32.mrb[8].mxu0 }
 0x608   : > { %1381 = vst.msk [vmem:[%s3268_s9 + $0xe8] sm:$0xff] %vm333_vm0, %v2711_v14  ;;  %v1357_v16 = vpop.f32.mrb[9].mxu0 }
 0x609   : > { %v2730_v17 = vpop.f32.mrb[38].mxu1  ;;  %1380 = vst.msk [vmem:[%s3268_s9 + $0xe0] sm:$0xff] %vm333_vm0, %v1357_v16 }
 0x60a   : > { %1629 = vst.msk [vmem:[%s3268_s9 + $0x128] sm:$0xff] %vm333_vm0, %v2730_v17  ;;  %v1605_v18 = vpop.f32.mrb[39].mxu1 }
 0x60b   : > { %1628 = vst.msk [vmem:[%s3268_s9 + $0x120] sm:$0xff] %vm333_vm0, %v1605_v18  ;;  %v2714_v19 = vpop.f32.mrb[10].mxu0 }
 0x60c   : > { %1383 = vst.msk [vmem:[%s3268_s9 + $0xf8] sm:$0xff] %vm333_vm0, %v2714_v19  ;;  %v1367_v20 = vpop.f32.mrb[11].mxu0 }
 0x60d   : > { %v2733_v21 = vpop.f32.mrb[40].mxu1  ;;  %1382 = vst.msk [vmem:[%s3268_s9 + $0xf0] sm:$0xff] %vm333_vm0, %v1367_v20 }
 0x60e   : > { %1631 = vst.msk [vmem:[%s3268_s9 + $0x138] sm:$0xff] %vm333_vm0, %v2733_v21  ;;  %v1615_v31 = vpop.f32.mrb[41].mxu1 }
 0x60f   : > { %1630 = vst.msk [vmem:[%s3268_s9 + $0x130] sm:$0xff] %vm333_vm0, %v1615_v31 }
 0x611   : > { %v1731_v30 = vpop.f32.mrb[42].mxu1 }
 0x612   : > { %v2738_v32 = vpop.f32.mrb[43].mxu1  ;;  %2739 = vmatprep.subr.mxu0 %v1731_v30 }
 0x613   : > { %2740 = vmatpush3.msra.mxu0 %v1731_v30 }
 0x614   : > { %2742 = vmatmul.mubr.msk.f32.vlgmr.msra.gmra.mrb[12].mxu0 %vm421_vm9, %v3204_v50  ;;  %2772 = vmatprep.subr.mxu0 %v2923_v22 }
 0x615   : > { %v1979_v34 = vpop.f32.mrb[44].mxu1  ;;  %2744 = vmatprep.mubr.msk.f32.mxu0 %vm421_vm9, %v3209_v52  ;;  %2773 = vmatpush3.msra.mxu0 %v3051_v26  ;;  %v2150_v26 = vsel %vm406_vm2, %v3046_v25, %v2130_v5 }
 0x616   : > { %v2757_v35 = vpop.f32.mrb[45].mxu1  ;;  %2758 = vmatprep.subr.mxu1 %v1979_v34  ;;  %v2151_v37 = vsel %vm408_vm3, %v2150_v26, %v2133_v9 }
 0x617   : > { %2759 = vmatpush3.msra.mxu1 %v1979_v34  ;;  %v2152_v38 = vsel %vm410_vm4, %v2151_v37, %v2136_v15 }
 0x618   : > { %2745 = vmatmul.mubr.msk.f32.gmra.mrb[14].mxu0 %vm421_vm9, %v3219_v54  ;;  %2761 = vmatmul.mubr.msk.f32.vlgmr.msra.gmra.mrb[46].mxu1 %vm421_vm9, %v3204_v50  ;;  %v2153_v39 = vsel %vm412_vm5, %v2152_v38, %v2139_v23 }
 0x619   : > { %2747 = vmatprep.mubr.msk.f32.mxu0 %vm421_vm9, %v3225_v55  ;;  %2763 = vmatprep.mubr.msk.f32.mxu1 %vm421_vm9, %v3209_v52  ;;  %v2154_v25 = vsel %vm414_vm6, %v2153_v39, %v2142_v33 }
 0x61a   : > { %v2155_v41 = vsel %vm416_vm7, %v2154_v25, %v2145_v36 }
 0x61b   : > { %v2156_v42 = vsel %vm418_vm8, %v2155_v41, %v2148_v40 }
 0x61c   : > { %2748 = vmatmul.mubr.msk.f32.gmra.mrb[16].mxu0 %vm421_vm9, %v3237_v59  ;;  %2764 = vmatmul.mubr.msk.f32.gmra.mrb[48].mxu1 %vm421_vm9, %v3219_v54 }
 0x61d   : > { %2750 = vmatprep.mubr.msk.f32.mxu0 %vm421_vm9, %v3242_v61  ;;  %2766 = vmatprep.mubr.msk.f32.mxu1 %vm421_vm9, %v3225_v55 }
 0x620   : > { %2751 = vmatmul.mubr.msk.f32.gmra.mrb[18].mxu0 %vm421_vm9, %v3253_v1  ;;  %2767 = vmatmul.mubr.msk.f32.gmra.mrb[50].mxu1 %vm421_vm9, %v3237_v59 }
 0x621   : > { %2774 = vmatprep.mubr.msk.f32.mxu0 %vm2926_vm1, %v2923_v22  ;;  %2769 = vmatprep.mubr.msk.f32.mxu1 %vm421_vm9, %v3242_v61 }
 0x624   : > { %2775 = vmatmul.mubr.msk.f32.vlgmr.msra.gmra.mrb[20].mxu0 %vm421_vm9, %v2156_v42  ;;  %2770 = vmatmul.mubr.msk.f32.gmra.mrb[52].mxu1 %vm421_vm9, %v3253_v1 }
 0x625   : > { %2779 = vmatprep.mubr.msk.f32.mxu0 %vm421_vm9, %v3195_v46 }
 0x6e7   : > { %v2743_v22 = vpop.f32.mrb[12].mxu0 }
 0x6e8   : > { %1873 = vst.msk [vmem:[%s3268_s9 + $0x148] sm:$0xff] %vm333_vm0, %v2743_v22  ;;  %v1833_v43 = vpop.f32.mrb[13].mxu0 }
 0x6e9   : > { %1872 = vst.msk [vmem:[%s3268_s9 + $0x140] sm:$0xff] %vm333_vm0, %v1833_v43 }
 0x6eb   : > { %v2746_v44 = vpop.f32.mrb[14].mxu0  ;;  %v2762_v45 = vpop.f32.mrb[46].mxu1 }
 0x6ec   : > { %1875 = vst.msk [vmem:[%s3268_s9 + $0x158] sm:$0xff] %vm333_vm0, %v2746_v44  ;;  %v1843_v47 = vpop.f32.mrb[15].mxu0  ;;  %2121 = vst.msk [vmem:[%s3268_s9 + $0x188] sm:$0xff] %vm333_vm0, %v2762_v45 }
 0x6ed   : > { %1874 = vst.msk [vmem:[%s3268_s9 + $0x150] sm:$0xff] %vm333_vm0, %v1843_v47 }
 0x6ef   : > { %v2749_v48 = vpop.f32.mrb[16].mxu0 }
 0x6f0   : > { %1877 = vst.msk [vmem:[%s3268_s9 + $0x168] sm:$0xff] %vm333_vm0, %v2749_v48  ;;  %v1853_v46 = vpop.f32.mrb[17].mxu0 }
 0x6f1   : > { %1876 = vst.msk [vmem:[%s3268_s9 + $0x160] sm:$0xff] %vm333_vm0, %v1853_v46 }
 0x6f3   : > { %v2752_v27 = vpop.f32.mrb[18].mxu0 }
 0x6f4   : > { %1879 = vst.msk [vmem:[%s3268_s9 + $0x178] sm:$0xff] %vm333_vm0, %v2752_v27  ;;  %v1863_v49 = vpop.f32.mrb[19].mxu0 }
 0x6f5   : > { %1878 = vst.msk [vmem:[%s3268_s9 + $0x170] sm:$0xff] %vm333_vm0, %v1863_v49 }
 0x6f7   : > { %v2227_v51 = vpop.f32.mrb[20].mxu0 }
 0x6f8   : > { %v2776_v53 = vpop.f32.mrb[21].mxu0  ;;  %2777 = vmatprep.subr.mxu0 %v2227_v51 }
 0x6f9   : > { %2778 = vmatpush3.msra.mxu0 %v2227_v51 }
 0x6fa   : > { %2780 = vmatmul.mubr.msk.f32.vlgmr.msra.gmra.mrb[22].mxu0 %vm421_vm9, %v3204_v50  ;;  %v2081_v50 = vpop.f32.mrb[47].mxu1 }
 0x6fb   : > { %2782 = vmatprep.mubr.msk.f32.mxu0 %vm421_vm9, %v3209_v52  ;;  %2120 = vst.msk [vmem:[%s3268_s9 + $0x180] sm:$0xff] %vm333_vm0, %v2081_v50  ;;  %v2765_v52 = vpop.f32.mrb[48].mxu1 }
 0x6fc   : > { %2123 = vst.msk [vmem:[%s3268_s9 + $0x198] sm:$0xff] %vm333_vm0, %v2765_v52 }
 0x6fe   : > { %2783 = vmatmul.mubr.msk.f32.gmra.mrb[24].mxu0 %vm421_vm9, %v3219_v54  ;;  %v2091_v54 = vpop.f32.mrb[49].mxu1 }
 0x6ff   : > { %2785 = vmatprep.mubr.msk.f32.mxu0 %vm421_vm9, %v3225_v55  ;;  %2122 = vst.msk [vmem:[%s3268_s9 + $0x190] sm:$0xff] %vm333_vm0, %v2091_v54  ;;  %v2768_v55 = vpop.f32.mrb[50].mxu1 }
 0x700   : > { %2125 = vst.msk [vmem:[%s3268_s9 + $0x1a8] sm:$0xff] %vm333_vm0, %v2768_v55 }
 0x702   : > { %2786 = vmatmul.mubr.msk.f32.gmra.mrb[26].mxu0 %vm421_vm9, %v3237_v59  ;;  %v2101_v59 = vpop.f32.mrb[51].mxu1 }
 0x703   : > { %2788 = vmatprep.mubr.msk.f32.mxu0 %vm421_vm9, %v3242_v61  ;;  %2124 = vst.msk [vmem:[%s3268_s9 + $0x1a0] sm:$0xff] %vm333_vm0, %v2101_v59  ;;  %v2771_v61 = vpop.f32.mrb[52].mxu1 }
 0x704   : > { %2127 = vst.msk [vmem:[%s3268_s9 + $0x1b8] sm:$0xff] %vm333_vm0, %v2771_v61 }
 0x706   : > { %2789 = vmatmul.mubr.msk.f32.gmra.mrb[28].mxu0 %vm421_vm9, %v3253_v1  ;;  %v2111_v1 = vpop.f32.mrb[53].mxu1 }
 0x707   : > { %2126 = vst.msk [vmem:[%s3268_s9 + $0x1b0] sm:$0xff] %vm333_vm0, %v2111_v1 }
 0x7cd   : > { %v2781_v56 = vpop.f32.mrb[22].mxu0 }
 0x7ce   : > { %2369 = vst.msk [vmem:[%s3268_s9 + $0x1c8] sm:$0xff] %vm333_vm0, %v2781_v56  ;;  %v2329_v57 = vpop.f32.mrb[23].mxu0 }
 0x7cf   : > { %2368 = vst.msk [vmem:[%s3268_s9 + $0x1c0] sm:$0xff] %vm333_vm0, %v2329_v57 }
 0x7d1   : > { %v2784_v58 = vpop.f32.mrb[24].mxu0 }
 0x7d2   : > { %2371 = vst.msk [vmem:[%s3268_s9 + $0x1d8] sm:$0xff] %vm333_vm0, %v2784_v58  ;;  %v2339_v60 = vpop.f32.mrb[25].mxu0 }
 0x7d3   : > { %2370 = vst.msk [vmem:[%s3268_s9 + $0x1d0] sm:$0xff] %vm333_vm0, %v2339_v60 }
 0x7d5   : > { %v2787_v62 = vpop.f32.mrb[26].mxu0 }
 0x7d6   : > { %2373 = vst.msk [vmem:[%s3268_s9 + $0x1e8] sm:$0xff] %vm333_vm0, %v2787_v62  ;;  %v2349_v63 = vpop.f32.mrb[27].mxu0 }
 0x7d7   : > { %2372 = vst.msk [vmem:[%s3268_s9 + $0x1e0] sm:$0xff] %vm333_vm0, %v2349_v63 }
 0x7d9   : > { %v2790_v24 = vpop.f32.mrb[28].mxu0 }
 0x7da   : > { %2375 = vst.msk [vmem:[%s3268_s9 + $0x1f8] sm:$0xff] %vm333_vm0, %v2790_v24  ;;  %v2359_v0 = vpop.f32.mrb[29].mxu0 }
 0x7db   : > { %2374 = vst.msk [vmem:[%s3268_s9 + $0x1f0] sm:$0xff] %vm333_vm0, %v2359_v0 }
 0x7dc   : > { %2871 = shalt.err (!%p2868_p3)
}
 0x7dd   : > { %s2872_s25 = scalar_lea.hbm %s3588_s14, 8192  ;;  %s2876_s6 = scalar_lea.hbm %s3644_s5, 16384 }
 0x7de   : > { %p2873_p4 = scmp.ne.s32.totalorder %s3588_s14, %s2872_s25  ;;  %p2877_p9 = scmp.lt.u32.totalorder %s3588_s14, %s3644_s5 }
 0x7df   : > { %p2878_p10 = scmp.lt.u32.totalorder %s2876_s6, %s2872_s25  ;;  %p2880_p12 = scmp.lt.u32.totalorder %s2872_s25, %s3588_s14 }
 0x7e0   : > { %p2874_p7 = pnand %p2873_p4, %p3003_p5 }
 0x7e1   : > { %p2879_p11 = por %p2878_p10, %p2877_p9 }
 0x7e2   : > { %p2875_p8 = pneg %p2874_p7 }
 0x7e3   : > { %p2881_p13 = por %p2880_p12, %p2879_p11 }
 0x7e5   : > { %p2882_p0 = pnand %p2881_p13, %p2875_p8 }
 0x7e7   : > { %2885 = shalt.err (!%p2882_p0)
}
 0x7e8   : > { %s2933_s9 = smov 128   ;;  %s2934_s10 = smov 8  }
 0x7e9   : > { %2792 = dma.vmem_to_hbm [thread:$0]  (%p3003_p5), %s3590_s11, 8192, %s3588_s14, %s3598_s22, %s2933_s9, %s2933_s9, %s2934_s10  }
 0x7ea PF: > { %p2798_p1 = scmp.ge.s32.totalorder %s2920_s21, 2  ;;  %s2405_s12 = sand.u32 1, %s2908_s18  }
 0x7eb   : > { %s2406_s13 = scalar_lea.sflag [#allocation3], %s2405_s12 }
 0x7ec   : > { %p2795_p2 = pnand %p2798_p1, %p3007_p6 }
 0x7ee   : > { %2903 = dma.done.wait (!%p2795_p2), %s2406_s13, 8192  }
 0x7ef   : > { %2905 = vsyncadd (!%p2795_p2), %s2406_s13, 4294959104  ;;  %p15_p3 = scmp.ge.s32.totalorder %s2990_s24, 4   ;;  %s3647_s18 = smov %s2912_s19 }
 0x7f0   : > { %s3648_s19 = smov %s2916_s20  ;;  %s3649_s20 = smov %s3001_s27 }
 0x7f1   : > { %s3650_s21 = smov %s2990_s24  ;;  %17 = sbr.rel (!%p15_p3) target bundleno = 3 (0x3), region = 75 }
 0x7f8   :  { %2411 = vsyncpa [#allocation3], 1 }
 0x7f9   :  { %2413 = vsyncpa [#allocation3 + $0x1], 1 }

</bundles_post_ra>
